<compile_context>
chip_gen: v7x
topology: tpu7x:2x2x1
jax: 0.10.0
libtpu: 0.0.40
codegen_flags: <defaults>
</compile_context>

<pallas_src>
import jax
import jax.numpy as jnp
import numpy as np
from jax.experimental import pallas as pl
from jax.experimental.pallas import tpu as pltpu


LEAKY_SLOPE = 0.01  # nn.LeakyReLU default negative_slope
_DN_TRANS_B = (((1,), (1,)), ((), ()))  # contract last dim of both operands: x @ W^T


def _round_up(x, m):
    return (x + m - 1) // m * m


def _row_tile(n_rows, cap=512):
    """Row tile: >=16 rows (bf16 sublane packing), a multiple of 128 once the batch can
    fill the MXU M dimension, capped to amortize the ~0.35us per-grid-step overhead."""
    t = _round_up(max(int(n_rows), 1), 16)
    if t > 128:
        t = _round_up(t, 128)
    return min(t, cap)


def _vmem_limit_bytes(request_bytes):
    """Generation-aware VMEM limit: ~75% of physical VMEM as the cap (~48 MiB on v7x,
    ~96 MiB on v5e/v6e), at least 4 MiB, at least the requested working set."""
    try:
        cap = int(pltpu.get_tpu_info().vmem_capacity_bytes)
    except Exception:
        cap = 64 << 20  # conservative fallback (v7x physical VMEM)
    cap = (cap * 3) // 4
    return int(min(max(int(request_bytes), 4 << 20), cap))


def _pad_last2(a, rows, cols):
    pads = [(0, 0)] * (a.ndim - 2) + [(0, rows - a.shape[-2]), (0, cols - a.shape[-1])]
    return jnp.pad(a, pads)


# ----------------------------------------------------------------------------
# Fused, episode-batched kernel: generateParams() + forward() in one pallas_call.
# Grid = (episodes, query-row tiles).  Per episode, query-tile 0 builds the prototype
# head and stashes it in VMEM scratch; every tile consumes it straight from scratch.
# ----------------------------------------------------------------------------
def _episode_kernel(lab_ref, sup_ref, qry_ref, w1_ref, b1_ref,
                    logits_ref, ffnw_ref, ffnb_ref, w_sc, b_sc):
    f32, bf16 = jnp.float32, jnp.bfloat16

    # --- prototype / head pipeline: only on the first query tile of each episode ------
    @pl.when(pl.program_id(1) == 0)
    def _build_head():
        c_pad, h_pad = ffnw_ref.shape
        bs_pad = sup_ref.shape[0]

        # sharedLinear (+ LeakyReLU) on support rows -- bf16 MXU inputs, f32 accumulate.
        h_sup = jax.lax.dot_general(sup_ref[...], w1_ref[...], _DN_TRANS_B,
                                    preferred_element_type=f32)
        h_sup = h_sup + b1_ref[...]
        h_sup = jnp.where(h_sup > 0, h_sup, LEAKY_SLOPE * h_sup)

        # One-hot built in-kernel from the int32 label row; padded rows carry label -1
        # so they never hit a class row.
        cls_ids = jax.lax.broadcasted_iota(jnp.int32, (c_pad, bs_pad), 0)
        onehot = (lab_ref[...] == cls_ids).astype(f32)                  # [C_pad, Bs_pad]
        # max(count, 1): empty / padded classes -> zero prototype (the PyTorch reference
        # would produce NaN for an empty class; documented semantic divergence).
        inv_cnt = 1.0 / jnp.maximum(jnp.sum(onehot, axis=1, keepdims=True), 1.0)
        # Per-class mean fully in f32 (K = Bs_pad, so the f32 matmul is tiny).
        proto = jnp.dot(onehot, h_sup, preferred_element_type=f32) * inv_cnt

        ffn_w = 2.0 * proto
        # -||proto||^2 produced lane-major ([1, C_pad]) via a ones-row matvec on the MXU
        # (keeps the ffn_b store and the logits bias-add lane-dense, no XLU transpose).
        ones_row = jnp.ones((1, h_pad), f32)
        ffn_b = -jax.lax.dot_general(ones_row, proto * proto, _DN_TRANS_B,
                                     preferred_element_type=f32)        # [1, C_pad]

        ffnw_ref[...] = ffn_w            # grid-invariant output block: persists across i
        ffnb_ref[...] = ffn_b
        w_sc[...] = ffn_w.astype(bf16)   # pre-cast once; reused by every query tile
        b_sc[...] = ffn_b

    # --- forward() on this query tile: head consumed straight from VMEM scratch -------
    h_q = jax.lax.dot_general(qry_ref[...], w1_ref[...], _DN_TRANS_B,
                              preferred_element_type=f32)
    h_q = h_q + b1_ref[...]
    h_q = jnp.where(h_q > 0, h_q, LEAKY_SLOPE * h_q)
    logits = jax.lax.dot_general(h_q.astype(bf16), w_sc[...], _DN_TRANS_B,
                                 preferred_element_type=f32)            # [TQ, C_pad]
    logits_ref[...] = (logits + b_sc[...]).astype(logits_ref.dtype)


def protomaml_episodes(support_feats, support_labels, classes, query_feats, w1, b1):
    """Batched fused generateParams() + forward() over E episodes in ONE pallas_call.

    support_feats: [E, Bs, H] CLS features of the support sets
    support_labels: [E, Bs] int labels;  classes: [C] int class ids (shared N-way set)
    query_feats: [E, Bq, H] CLS features of the query sets
    w1: [H, H] sharedLinear weight;  b1: [H] sharedLinear bias
    Returns (logits [E, Bq, C], ffn_W [E, C, H], ffn_b [E, C]).
    """
    E, Bs, H = support_feats.shape
    Bq = query_feats.shape[1]
    C = classes.shape[0]

    H_pad = _round_up(H, 128)
    C_pad = _round_up(C, 128)          # lane-dense logits / ffn_W / ffn_b
    Bs_pad = _round_up(Bs, 16)         # bf16 sublane packing
    TQ = _row_tile(Bq)
    Bq_pad = _round_up(Bq, TQ)
    n_qt = Bq_pad // TQ

    # Map labels -> class indices (pad / unmatched -> -1 so they never hit a class row).
    eq = support_labels[..., None] == classes[None, None, :]
    lab_idx = jnp.where(eq.any(-1), jnp.argmax(eq, -1), -1).astype(jnp.int32)  # [E, Bs]
    lab = jnp.full((E, 1, Bs_pad), -1, jnp.int32).at[:, 0, :Bs].set(lab_idx)

    sup = _pad_last2(support_feats, Bs_pad, H_pad).astype(jnp.bfloat16)
    qry = _pad_last2(query_feats, Bq_pad, H_pad).astype(jnp.bfloat16)
    w1p = _pad_last2(w1, H_pad, H_pad).astype(jnp.bfloat16)   # NOT transposed (trans_b dot)
    b1p = jnp.pad(b1, (0, H_pad - H)).reshape(1, H_pad).astype(jnp.float32)

    block_bytes = (2 * (Bs_pad * H_pad + TQ * H_pad + H_pad * H_pad)    # bf16 in blocks
                   + 4 * (Bs_pad + H_pad)                               # labels + bias
                   + 4 * (TQ * C_pad + C_pad * H_pad + C_pad)           # f32 out blocks
                   + 2 * C_pad * H_pad + 4 * C_pad)                     # scratch head
    vmem_limit = _vmem_limit_bytes(3 * block_bytes)

    logits, ffn_w, ffn_b2d = pl.pallas_call(
        _episode_kernel,
        out_shape=(
            jax.ShapeDtypeStruct((E, Bq_pad, C_pad), jnp.float32),
            jax.ShapeDtypeStruct((E, C_pad, H_pad), jnp.float32),
            jax.ShapeDtypeStruct((E, 1, C_pad), jnp.float32),
        ),
        grid=(E, n_qt),
        in_specs=[
            pl.BlockSpec((None, 1, Bs_pad), lambda e, i: (e, 0, 0)),      # labels
            pl.BlockSpec((None, Bs_pad, H_pad), lambda e, i: (e, 0, 0)),  # support feats
            pl.BlockSpec((None, TQ, H_pad), lambda e, i: (e, i, 0)),      # query tile
            pl.BlockSpec((H_pad, H_pad), lambda e, i: (0, 0)),            # W1 (resident)
            pl.BlockSpec((1, H_pad), lambda e, i: (0, 0)),                # b1
        ],
        out_specs=(
            pl.BlockSpec((None, TQ, C_pad), lambda e, i: (e, i, 0)),      # logits tile
            pl.BlockSpec((None, C_pad, H_pad), lambda e, i: (e, 0, 0)),   # ffn_W
            pl.BlockSpec((None, 1, C_pad), lambda e, i: (e, 0, 0)),       # ffn_b
        ),
        scratch_shapes=[
            pltpu.VMEM((C_pad, H_pad), jnp.bfloat16),   # bf16 head for the logits matmul
            pltpu.VMEM((1, C_pad), jnp.float32),        # lane-major bias
        ],
        compiler_params=pltpu.CompilerParams(
            # Episodes are independent -> "parallel" (feeds both TCs on v7x).  The inner
            # query-tile axis carries the head through scratch + the grid-invariant ffn
            # output blocks, so it stays sequential ("arbitrary").
            dimension_semantics=("parallel", "arbitrary"),
            vmem_limit_bytes=vmem_limit,
        ),
    )(lab, sup, qry, w1p, b1p)

    return logits[:, :Bq, :C], ffn_w[:, :C, :H], ffn_b2d[:, 0, :C]


def protomaml_episode(support_feats, support_labels, classes, query_feats, w1, b1):
    """Single-episode convenience wrapper (E = 1) around the batched kernel."""
    logits, ffn_w, ffn_b = protomaml_episodes(
        support_feats[None], support_labels[None], classes, query_feats[None], w1, b1)
    return logits[0], ffn_w[0], ffn_b[0]


# ----------------------------------------------------------------------------
# Standalone forward kernel (module forward() when ffn_W / ffn_b already exist,
# e.g. after MAML inner-loop updates):  leaky_relu(x @ W1^T + b1) @ ffn_W^T + ffn_b
# ----------------------------------------------------------------------------
def _forward_kernel(x_ref, w1_ref, b1_ref, w2_ref, b2_ref, o_ref):
    f32, bf16 = jnp.float32, jnp.bfloat16
    h = jax.lax.dot_general(x_ref[...], w1_ref[...], _DN_TRANS_B,
                            preferred_element_type=f32)
    h = h + b1_ref[...]
    h = jnp.where(h > 0, h, LEAKY_SLOPE * h)
    out = jax.lax.dot_general(h.astype(bf16), w2_ref[...], _DN_TRANS_B,
                              preferred_element_type=f32)
    o_ref[...] = (out + b2_ref[...]).astype(o_ref.dtype)


def protomaml_forward(feats, w1, b1, ffn_w, ffn_b):
    """feats: [B, H]; w1: [H, H]; b1: [H]; ffn_w: [C, H]; ffn_b: [C]. Returns [B, C]."""
    B, H = feats.shape
    C = ffn_w.shape[0]
    H_pad = _round_up(H, 128)
    C_pad = _round_up(C, 128)
    TB = _row_tile(B)
    B_pad = _round_up(B, TB)

    x = _pad_last2(feats, B_pad, H_pad).astype(jnp.bfloat16)
    w1p = _pad_last2(w1, H_pad, H_pad).astype(jnp.bfloat16)
    b1p = jnp.pad(b1, (0, H_pad - H)).reshape(1, H_pad).astype(jnp.float32)
    w2p = _pad_last2(ffn_w, C_pad, H_pad).astype(jnp.bfloat16)
    b2p = jnp.pad(ffn_b, (0, C_pad - C)).reshape(1, C_pad).astype(jnp.float32)

    block_bytes = (2 * (TB * H_pad + H_pad * H_pad + C_pad * H_pad)
                   + 4 * (H_pad + C_pad) + 4 * TB * C_pad)
    vmem_limit = _vmem_limit_bytes(3 * block_bytes)

    out = pl.pallas_call(
        _forward_kernel,
        out_shape=jax.ShapeDtypeStruct((B_pad, C_pad), jnp.float32),
        grid=(B_pad // TB,),
        in_specs=[
            pl.BlockSpec((TB, H_pad), lambda i: (i, 0)),
            pl.BlockSpec((H_pad, H_pad), lambda i: (0, 0)),
            pl.BlockSpec((1, H_pad), lambda i: (0, 0)),
            pl.BlockSpec((C_pad, H_pad), lambda i: (0, 0)),
            pl.BlockSpec((1, C_pad), lambda i: (0, 0)),
        ],
        out_specs=pl.BlockSpec((TB, C_pad), lambda i: (i, 0)),
        compiler_params=pltpu.CompilerParams(
            dimension_semantics=("parallel",),   # independent row tiles (v7x dual-TC)
            vmem_limit_bytes=vmem_limit,
        ),
    )(x, w1p, b1p, w2p, b2p)
    return out[:B, :C]


# ----------------------------------------------------------------------------
# Pure-JAX reference (mirrors the PyTorch semantics exactly, f32)
# ----------------------------------------------------------------------------
def _ref_shared_linear(x, w1, b1):
    h = x @ w1.T + b1
    return jnp.where(h > 0, h, LEAKY_SLOPE * h)


def _ref_generate_params(support_feats, support_labels, classes, w1, b1):
    h = _ref_shared_linear(support_feats, w1, b1)
    protos = []
    for c in range(classes.shape[0]):
        mask = (support_labels == classes[c]).astype(jnp.float32)
        proto = jnp.sum(h * mask[:, None], axis=0) / jnp.sum(mask)
        protos.append(proto)
    protos = jnp.stack(protos)
    return 2.0 * protos, -jnp.sum(protos * protos, axis=1)


def _ref_forward(feats, w1, b1, ffn_w, ffn_b):
    h = _ref_shared_linear(feats, w1, b1)
    return h @ ffn_w.T + ffn_b


# ----------------------------------------------------------------------------
if __name__ == "__main__":
    key = jax.random.PRNGKey(0)
    k_w1, k_b1, k_sup, k_qry, k_lab = jax.random.split(key, 5)

    # Small, module-consistent shapes (hidden stands in for BERT's 768).
    HIDDEN = 128
    N_SUPPORT = 16
    N_QUERY = 8
    N_CLASSES = 4
    EPISODES = 3        # batched episodes: one pallas_call, W1 DMA'd once

    bound = 1.0 / np.sqrt(HIDDEN)
    w1 = jax.random.uniform(k_w1, (HIDDEN, HIDDEN), jnp.float32, -bound, bound)
    b1 = jax.random.uniform(k_b1, (HIDDEN,), jnp.float32, -bound, bound)

    # Stand-in BERT CLS features for the support & query sets of every episode.
    support_feats = jax.random.normal(k_sup, (EPISODES, N_SUPPORT, HIDDEN), jnp.float32)
    query_feats = jax.random.normal(k_qry, (EPISODES, N_QUERY, HIDDEN), jnp.float32)
    classes = jnp.arange(N_CLASSES, dtype=jnp.int32)
    # Ensure every class has at least one support example per episode.
    rnd = jax.random.randint(k_lab, (EPISODES, N_SUPPORT - N_CLASSES), 0, N_CLASSES,
                             jnp.int32)
    support_labels = jnp.concatenate(
        [jnp.tile(classes[None, :], (EPISODES, 1)), rnd], axis=1)

    # Fused, episode-batched generateParams() + forward().
    logits, ffn_w, ffn_b = protomaml_episodes(
        support_feats, support_labels, classes, query_feats, w1, b1)
    # Single-episode convenience wrapper.
    logits1, ffn_w1, ffn_b1 = protomaml_episode(
        support_feats[0], support_labels[0], classes, query_feats[0], w1, b1)
    # Standalone forward() (as used in the MAML inner loop once the head exists).
    logits2 = protomaml_forward(query_feats[0], w1, b1, ffn_w[0], ffn_b[0])
    jax.block_until_ready((logits, ffn_w, ffn_b, logits1, ffn_w1, ffn_b1, logits2))

    # Check against the pure-f32 reference (bf16 matmul inputs -> loosened tolerances;
    # f32 class-mean reduction keeps ffn_W / ffn_b tight).
    for e in range(EPISODES):
        ref_w, ref_b = _ref_generate_params(
            support_feats[e], support_labels[e], classes, w1, b1)
        ref_logits = _ref_forward(query_feats[e], w1, b1, ref_w, ref_b)
        np.testing.assert_allclose(np.asarray(ffn_w[e]), np.asarray(ref_w),
                                   rtol=2e-2, atol=3e-2)
        np.testing.assert_allclose(np.asarray(ffn_b[e]), np.asarray(ref_b),
                                   rtol=2e-2, atol=5e-2)
        np.testing.assert_allclose(np.asarray(logits[e]), np.asarray(ref_logits),
                                   rtol=2e-2, atol=2e-1)

    # Single-episode wrapper and standalone forward agree with the batched path.
    np.testing.assert_allclose(np.asarray(logits1), np.asarray(logits[0]),
                               rtol=1e-5, atol=1e-5)
    np.testing.assert_allclose(np.asarray(logits2), np.asarray(logits[0]),
                               rtol=2e-2, atol=2e-1)

    print("KERNEL_OK")
</pallas_src>

<mosaic_0001>
module attributes {stable_mosaic.version = 11 : i64} {
  func.func @_episode_kernel(%arg0: i32, %arg1: i32, %arg2: memref<1x1x16xi32, #tpu.memory_space<vmem>>, %arg3: memref<1x16x128xbf16, #tpu.memory_space<vmem>>, %arg4: memref<1x16x128xbf16, #tpu.memory_space<vmem>>, %arg5: memref<128x128xbf16, #tpu.memory_space<vmem>>, %arg6: memref<1x128xf32, #tpu.memory_space<vmem>>, %arg7: memref<1x16x128xf32, #tpu.memory_space<vmem>>, %arg8: memref<1x128x128xf32, #tpu.memory_space<vmem>>, %arg9: memref<1x1x128xf32, #tpu.memory_space<vmem>>, %arg10: memref<128x128xbf16, #tpu.memory_space<vmem>>, %arg11: memref<1x128xf32, #tpu.memory_space<vmem>>) attributes {dimension_semantics = [#tpu.dimension_semantics<parallel>, #tpu.dimension_semantics<arbitrary>], iteration_bounds = array<i64: 3, 1>, scalar_prefetch = 0 : i64, scratch_operands = 2 : i64, tpu.core_type = #tpu.core_type<tc>, window_params = [{transform_indices = @transform_0, window_bounds = array<i64: 1, 1, 16>}, {transform_indices = @transform_1, window_bounds = array<i64: 1, 16, 128>}, {transform_indices = @transform_2, window_bounds = array<i64: 1, 16, 128>}, {pipeline_mode = #tpu.pipeline_mode<synchronous>, transform_indices = @transform_3, window_bounds = array<i64: 128, 128>}, {pipeline_mode = #tpu.pipeline_mode<synchronous>, transform_indices = @transform_4, window_bounds = array<i64: 1, 128>}, {transform_indices = @transform_5, window_bounds = array<i64: 1, 16, 128>}, {transform_indices = @transform_6, window_bounds = array<i64: 1, 128, 128>}, {transform_indices = @transform_7, window_bounds = array<i64: 1, 1, 128>}]} {
    %c0_i32 = arith.constant 0 : i32
    %0 = arith.cmpi eq, %arg1, %c0_i32 : i32
    %1 = arith.extui %0 : i1 to i32
    %c0_i32_0 = arith.constant 0 : i32
    %2 = arith.cmpi ne, %1, %c0_i32_0 : i32
    scf.if %2 {
      %c0_17 = arith.constant 0 : index
      %c0_18 = arith.constant 0 : index
      %c0_19 = arith.constant 0 : index
      %24 = vector.load %arg3[%c0_17, %c0_18, %c0_19] : memref<1x16x128xbf16, #tpu.memory_space<vmem>>, vector<1x16x128xbf16>
      %25 = vector.shape_cast %24 : vector<1x16x128xbf16> to vector<16x128xbf16>
      %c0_20 = arith.constant 0 : index
      %c0_21 = arith.constant 0 : index
      %26 = vector.load %arg5[%c0_20, %c0_21] : memref<128x128xbf16, #tpu.memory_space<vmem>>, vector<128x128xbf16>
      %cst_22 = arith.constant dense<0.000000e+00> : vector<16x128xf32>
      %27 = tpu.matmul %25, %26, %cst_22 {dimension_numbers = #tpu.dot_dimension_numbers<[1], [1], [0], [0], [0, 0, 1, 0], [], []>} : vector<16x128xbf16>, vector<128x128xbf16>, vector<16x128xf32> -> vector<16x128xf32>
      %c0_23 = arith.constant 0 : index
      %c0_24 = arith.constant 0 : index
      %28 = vector.load %arg6[%c0_23, %c0_24] : memref<1x128xf32, #tpu.memory_space<vmem>>, vector<1x128xf32>
      %29 = vector.broadcast %28 : vector<1x128xf32> to vector<16x128xf32>
      %30 = arith.addf %27, %29 : vector<16x128xf32>
      %cst_25 = arith.constant 0.000000e+00 : f32
      %31 = vector.broadcast %cst_25 : f32 to vector<16x128xf32>
      %32 = arith.cmpf ogt, %30, %31 : vector<16x128xf32>
      %cst_26 = arith.constant 0.00999999977 : f32
      %33 = vector.broadcast %cst_26 : f32 to vector<16x128xf32>
      %34 = arith.mulf %33, %30 : vector<16x128xf32>
      %35 = arith.select %32, %30, %34 : vector<16x128xi1>, vector<16x128xf32>
      %36 = tpu.iota {dimensions = array<i32: 0>} : vector<128x16xi32>
      %c0_27 = arith.constant 0 : index
      %c0_28 = arith.constant 0 : index
      %c0_29 = arith.constant 0 : index
      %37 = vector.load %arg2[%c0_27, %c0_28, %c0_29] : memref<1x1x16xi32, #tpu.memory_space<vmem>>, vector<1x1x16xi32>
      %38 = vector.shape_cast %37 : vector<1x1x16xi32> to vector<1x16xi32>
      %39 = vector.broadcast %38 : vector<1x16xi32> to vector<128x16xi32>
      %40 = arith.cmpi eq, %39, %36 : vector<128x16xi32>
      %41 = arith.extui %40 : vector<128x16xi1> to vector<128x16xi32>
      %42 = arith.sitofp %41 : vector<128x16xi32> to vector<128x16xf32>
      %cst_30 = arith.constant dense<0.000000e+00> : vector<128xf32>
      %43 = vector.multi_reduction <add>, %42, %cst_30 [1] : vector<128x16xf32> to vector<128xf32>
      %44 = vector.shape_cast %43 : vector<128xf32> to vector<128x1xf32>
      %cst_31 = arith.constant 1.000000e+00 : f32
      %45 = vector.broadcast %cst_31 : f32 to vector<128x1xf32>
      %46 = arith.maximumf %44, %45 : vector<128x1xf32>
      %cst_32 = arith.constant 1.000000e+00 : f32
      %47 = vector.broadcast %cst_32 : f32 to vector<128x1xf32>
      %48 = arith.divf %47, %46 : vector<128x1xf32>
      %cst_33 = arith.constant dense<0.000000e+00> : vector<128x128xf32>
      %49 = tpu.matmul %42, %35, %cst_33 {dimension_numbers = #tpu.dot_dimension_numbers<[1], [0], [0], [1], [0, 0, 1, 1], [], []>} : vector<128x16xf32>, vector<16x128xf32>, vector<128x128xf32> -> vector<128x128xf32>
      %50 = vector.broadcast %48 : vector<128x1xf32> to vector<128x128xf32>
      %51 = arith.mulf %49, %50 : vector<128x128xf32>
      %cst_34 = arith.constant 2.000000e+00 : f32
      %52 = vector.broadcast %cst_34 : f32 to vector<128x128xf32>
      %53 = arith.mulf %52, %51 : vector<128x128xf32>
      %cst_35 = arith.constant 1.000000e+00 : f32
      %54 = vector.broadcast %cst_35 : f32 to vector<1x128xf32>
      %55 = arith.mulf %51, %51 : vector<128x128xf32>
      %cst_36 = arith.constant dense<0.000000e+00> : vector<1x128xf32>
      %56 = tpu.matmul %54, %55, %cst_36 {dimension_numbers = #tpu.dot_dimension_numbers<[1], [1], [0], [0], [0, 0, 1, 0], [], []>} : vector<1x128xf32>, vector<128x128xf32>, vector<1x128xf32> -> vector<1x128xf32>
      %cst_37 = arith.constant 0.000000e+00 : f32
      %57 = vector.broadcast %cst_37 : f32 to vector<1x128xf32>
      %58 = arith.subf %57, %56 : vector<1x128xf32>
      %c0_38 = arith.constant 0 : index
      %c0_39 = arith.constant 0 : index
      %c0_40 = arith.constant 0 : index
      %59 = vector.load %arg8[%c0_38, %c0_39, %c0_40] : memref<1x128x128xf32, #tpu.memory_space<vmem>>, vector<1x128x128xf32>
      %60 = vector.shape_cast %59 : vector<1x128x128xf32> to vector<128x128xf32>
      %61 = vector.shape_cast %53 : vector<128x128xf32> to vector<1x128x128xf32>
      tpu.vector_store %arg8[%c0_38, %c0_39, %c0_40], %61 {strides = array<i32>} : memref<1x128x128xf32, #tpu.memory_space<vmem>>, vector<1x128x128xf32>,
      %c0_41 = arith.constant 0 : index
      %c0_42 = arith.constant 0 : index
      %c0_43 = arith.constant 0 : index
      %62 = vector.load %arg9[%c0_41, %c0_42, %c0_43] : memref<1x1x128xf32, #tpu.memory_space<vmem>>, vector<1x1x128xf32>
      %63 = vector.shape_cast %62 : vector<1x1x128xf32> to vector<1x128xf32>
      %64 = vector.shape_cast %58 : vector<1x128xf32> to vector<1x1x128xf32>
      tpu.vector_store %arg9[%c0_41, %c0_42, %c0_43], %64 {strides = array<i32>} : memref<1x1x128xf32, #tpu.memory_space<vmem>>, vector<1x1x128xf32>,
      %65 = arith.truncf %53 : vector<128x128xf32> to vector<128x128xbf16>
      %c0_44 = arith.constant 0 : index
      %c0_45 = arith.constant 0 : index
      %66 = vector.load %arg10[%c0_44, %c0_45] : memref<128x128xbf16, #tpu.memory_space<vmem>>, vector<128x128xbf16>
      tpu.vector_store %arg10[%c0_44, %c0_45], %65 {strides = array<i32>} : memref<128x128xbf16, #tpu.memory_space<vmem>>, vector<128x128xbf16>,
      %c0_46 = arith.constant 0 : index
      %c0_47 = arith.constant 0 : index
      %67 = vector.load %arg11[%c0_46, %c0_47] : memref<1x128xf32, #tpu.memory_space<vmem>>, vector<1x128xf32>
      tpu.vector_store %arg11[%c0_46, %c0_47], %58 {strides = array<i32>} : memref<1x128xf32, #tpu.memory_space<vmem>>, vector<1x128xf32>,
    } else {
    }
    %c0 = arith.constant 0 : index
    %c0_1 = arith.constant 0 : index
    %c0_2 = arith.constant 0 : index
    %3 = vector.load %arg4[%c0, %c0_1, %c0_2] : memref<1x16x128xbf16, #tpu.memory_space<vmem>>, vector<1x16x128xbf16>
    %4 = vector.shape_cast %3 : vector<1x16x128xbf16> to vector<16x128xbf16>
    %c0_3 = arith.constant 0 : index
    %c0_4 = arith.constant 0 : index
    %5 = vector.load %arg5[%c0_3, %c0_4] : memref<128x128xbf16, #tpu.memory_space<vmem>>, vector<128x128xbf16>
    %cst = arith.constant dense<0.000000e+00> : vector<16x128xf32>
    %6 = tpu.matmul %4, %5, %cst {dimension_numbers = #tpu.dot_dimension_numbers<[1], [1], [0], [0], [0, 0, 1, 0], [], []>} : vector<16x128xbf16>, vector<128x128xbf16>, vector<16x128xf32> -> vector<16x128xf32>
    %c0_5 = arith.constant 0 : index
    %c0_6 = arith.constant 0 : index
    %7 = vector.load %arg6[%c0_5, %c0_6] : memref<1x128xf32, #tpu.memory_space<vmem>>, vector<1x128xf32>
    %8 = vector.broadcast %7 : vector<1x128xf32> to vector<16x128xf32>
    %9 = arith.addf %6, %8 : vector<16x128xf32>
    %cst_7 = arith.constant 0.000000e+00 : f32
    %10 = vector.broadcast %cst_7 : f32 to vector<16x128xf32>
    %11 = arith.cmpf ogt, %9, %10 : vector<16x128xf32>
    %cst_8 = arith.constant 0.00999999977 : f32
    %12 = vector.broadcast %cst_8 : f32 to vector<16x128xf32>
    %13 = arith.mulf %12, %9 : vector<16x128xf32>
    %14 = arith.select %11, %9, %13 : vector<16x128xi1>, vector<16x128xf32>
    %15 = arith.truncf %14 : vector<16x128xf32> to vector<16x128xbf16>
    %c0_9 = arith.constant 0 : index
    %c0_10 = arith.constant 0 : index
    %16 = vector.load %arg10[%c0_9, %c0_10] : memref<128x128xbf16, #tpu.memory_space<vmem>>, vector<128x128xbf16>
    %cst_11 = arith.constant dense<0.000000e+00> : vector<16x128xf32>
    %17 = tpu.matmul %15, %16, %cst_11 {dimension_numbers = #tpu.dot_dimension_numbers<[1], [1], [0], [0], [0, 0, 1, 0], [], []>} : vector<16x128xbf16>, vector<128x128xbf16>, vector<16x128xf32> -> vector<16x128xf32>
    %c0_12 = arith.constant 0 : index
    %c0_13 = arith.constant 0 : index
    %18 = vector.load %arg11[%c0_12, %c0_13] : memref<1x128xf32, #tpu.memory_space<vmem>>, vector<1x128xf32>
    %19 = vector.broadcast %18 : vector<1x128xf32> to vector<16x128xf32>
    %20 = arith.addf %17, %19 : vector<16x128xf32>
    %c0_14 = arith.constant 0 : index
    %c0_15 = arith.constant 0 : index
    %c0_16 = arith.constant 0 : index
    %21 = vector.load %arg7[%c0_14, %c0_15, %c0_16] : memref<1x16x128xf32, #tpu.memory_space<vmem>>, vector<1x16x128xf32>
    %22 = vector.shape_cast %21 : vector<1x16x128xf32> to vector<16x128xf32>
    %23 = vector.shape_cast %20 : vector<16x128xf32> to vector<1x16x128xf32>
    tpu.vector_store %arg7[%c0_14, %c0_15, %c0_16], %23 {strides = array<i32>} : memref<1x16x128xf32, #tpu.memory_space<vmem>>, vector<1x16x128xf32>,
    return
  }
  func.func @transform_0(%arg0: i32, %arg1: i32) -> (i32, i32, i32) {
    %c0_i32 = arith.constant 0 : i32
    %c0_i32_0 = arith.constant 0 : i32
    %c0_i32_1 = arith.constant 0 : i32
    return %arg0, %c0_i32, %c0_i32_0 : i32, i32, i32
  }
  func.func @transform_1(%arg0: i32, %arg1: i32) -> (i32, i32, i32) {
    %c0_i32 = arith.constant 0 : i32
    %c0_i32_0 = arith.constant 0 : i32
    %c0_i32_1 = arith.constant 0 : i32
    return %arg0, %c0_i32, %c0_i32_0 : i32, i32, i32
  }
  func.func @transform_2(%arg0: i32, %arg1: i32) -> (i32, i32, i32) {
    %c0_i32 = arith.constant 0 : i32
    %c0_i32_0 = arith.constant 0 : i32
    return %arg0, %arg1, %c0_i32 : i32, i32, i32
  }
  func.func @transform_3(%arg0: i32, %arg1: i32) -> (i32, i32) {
    %c0_i32 = arith.constant 0 : i32
    %c0_i32_0 = arith.constant 0 : i32
    %c0_i32_1 = arith.constant 0 : i32
    return %c0_i32, %c0_i32_0 : i32, i32
  }
  func.func @transform_4(%arg0: i32, %arg1: i32) -> (i32, i32) {
    %c0_i32 = arith.constant 0 : i32
    %c0_i32_0 = arith.constant 0 : i32
    %c0_i32_1 = arith.constant 0 : i32
    return %c0_i32, %c0_i32_0 : i32, i32
  }
  func.func @transform_5(%arg0: i32, %arg1: i32) -> (i32, i32, i32) {
    %c0_i32 = arith.constant 0 : i32
    %c0_i32_0 = arith.constant 0 : i32
    return %arg0, %arg1, %c0_i32 : i32, i32, i32
  }
  func.func @transform_6(%arg0: i32, %arg1: i32) -> (i32, i32, i32) {
    %c0_i32 = arith.constant 0 : i32
    %c0_i32_0 = arith.constant 0 : i32
    %c0_i32_1 = arith.constant 0 : i32
    return %arg0, %c0_i32, %c0_i32_0 : i32, i32, i32
  }
  func.func @transform_7(%arg0: i32, %arg1: i32) -> (i32, i32, i32) {
    %c0_i32 = arith.constant 0 : i32
    %c0_i32_0 = arith.constant 0 : i32
    %c0_i32_1 = arith.constant 0 : i32
    return %arg0, %c0_i32, %c0_i32_0 : i32, i32, i32
  }
}

</mosaic_0001>

<bundles_post_ra>
// kernel: tpu_custom_call.1
= control target key start
LH: loop header
LB: loop body
LE: loop exit
PB: predicated region body
PF: predicated region fallthrough
CT: control target
= control target key end

     0   :  { %s2920_s0 = inlined_call_operand.hbm [shape: s32[3,1,16], index: 0, kind: input, shape index: {}]   ;;  %s2921_s1 = inlined_call_operand.hbm [shape: bf16[3,16,128], index: 1, kind: input, shape index: {}]   ;;  %s2922_s2 = inlined_call_operand.hbm [shape: bf16[3,16,128], index: 2, kind: input, shape index: {}]   ;;  %s2923_s3 = inlined_call_operand.hbm [shape: bf16[128,128], index: 3, kind: input, shape index: {}]   ;;  %s2924_s4 = inlined_call_operand.vmem [shape: f32[1,128], index: 4, kind: input, shape index: {}]   ;;  %s2925_s5 = inlined_call_operand.hbm [shape: f32[3,16,128], index: 5, kind: output, shape index: {0}]   ;;  %s2926_s6 = inlined_call_operand.hbm [shape: f32[3,128,128], index: 6, kind: output, shape index: {1}]   ;;  %s2927_s7 = inlined_call_operand.hbm [shape: f32[3,1,128], index: 7, kind: output, shape index: {2}]  }
   0x1   :  { %2951 = sst [smem:[#allocation28_spill]] %s2921_s1 }
   0x2   :  { %2952 = sst [smem:[#allocation29_spill]] %s2925_s5 }
   0x3   :  { %2953 = sst [smem:[#allocation30_spill]] %s2927_s7 }
   0x4   :  { %13 = vsyncpa [#allocation5], 0 }
   0x5   :  { %15 = vsyncpa [#allocation5 + $0x1], 0 }
   0x6   :  { %16 = vsyncpa [#allocation8], 0 }
   0x7   :  { %18 = vsyncpa [#allocation8 + $0x1], 0 }
   0x8   :  { %19 = vsyncpa [#allocation11], 0 }
   0x9   :  { %20 = vsyncpa [#allocation6], 0 }
   0xa   :  { %22 = vsyncpa [#allocation6 + $0x1], 0 }
   0xb   :  { %23 = vsyncpa [#allocation14], 0 }
   0xc   :  { %25 = vsyncpa [#allocation14 + $0x1], 0  ;;  %s2271_s24 = smov 0   ;;  %s2273_s25 = smov 0  }
   0xd   :  { %s2275_s26 = smov 0   ;;  %s2277_s27 = smov 0  }
   0xe   :  { %s2279_s28 = smov 0   ;;  %s2281_s29 = smov 0  }
   0xf LB: > { %2954 = sst [smem:[#allocation21_spill]] %s2194_s24  ;;  %s43_s30 = sadd.s32 1, %s2210_s28  ;;  %s2214_s29 = sphi %s2281_s29, %s31_s29   ;;  %s2210_s28 = sphi %s2279_s28, %s2989_s28   ;;  %s2206_s27 = sphi %s2277_s27, %s2988_s27   ;;  %s2202_s26 = sphi %s2275_s26, %s2987_s26   ;;  %s2198_s25 = sphi %s2273_s25, %s2991_s25   ;;  %s2194_s24 = sphi %s2271_s24, %s2990_s24  }
  0x10   : > { %2955 = sst [smem:[#allocation22_spill]] %s2202_s26  ;;  %s50_s8 = sadd.s32 1, %s2202_s26 }
  0x11   : > { %2956 = sst [smem:[#allocation23_spill]] %s2210_s28  ;;  %p45_p0 = scmp.ge.s32.totalorder %s43_s30, 3 }
  0x12   : > { %2957 = sst [smem:[#allocation24_spill]] %s2214_s29  ;;  %p2928_p1 = scmp.ne.s32.totalorder %s2202_s26, %s2198_s25 }
  0x13   : > { %p58_p2 = scmp.eq.s32.totalorder %s2214_s29, 0  ;;  %s2993_s30 = smov (%p45_p0, %s43_s30), 0 }
  0x14   : > { %2958 = sst [smem:[#allocation25_spill]] %s2993_s30  ;;  %s47_s9 = ssub.s32 %s2210_s28, %s2993_s30 }
  0x15   : > { %p59_p3 = por %p58_p2, %p2928_p1  ;;  %p48_p4 = scmp.eq.s32.totalorder %s47_s9, 0 }
  0x16   : > { %p1836_p5 = scmp.lt.s32.totalorder %s2214_s29, 3  ;;  %s2315_s10 = sand.u32 1, %s2202_s26  }
  0x17   : > { %s296_s11 = sand.u32 1, %s2214_s29   ;;  %s1503_s14 = sshll.u32 %s2315_s10, 3 }
  0x18   : > { %s2319_s12 = scalar_select %p48_p4, %s2202_s26, %s50_s8  }
  0x19   : > { %p2321_p6 = pnand %p1836_p5, %p59_p3  ;;  %s1578_s15 = sshll.u32 %s2210_s28, 7 }
  0x1a   : > { %2959 = sst [smem:[#allocation26_spill]] %s2319_s12  ;;  %s2961_s1 = sld [smem:[#allocation28_spill]] }
  0x1b   : > { %s2960_s13 = scalar_select %p2321_p6, 1, 0 }
  0x1c   : > { %s300_s19 = scalar_lea.vmem [#allocation7], %s1503_s14  ;;  %s2338_s21 = scalar_lea.sflag [#allocation8], %s296_s11 }
  0x1d   : > { %s307_s20 = sshll.u32 %s300_s19, 4  ;;  %p2344_p8 = pneg %p2321_p6  ;;  %s2336_s20 = int_to_ptr.vmem [resolvable:$true] %s307_s20 }
  0x1f   : > { %s2962_s23 = scalar_select %p2344_p8, 1, 0 }
  0x20   : > { %s2332_s18 = scalar_lea.hbm %s2961_s1, %s1578_s15  ;;  %s1951_s16 = scalar_lea.hbm %s2961_s1, 384 }
  0x21   : > { %s1946_s22 = scalar_lea.hbm %s2332_s18, 128  ;;  %p1952_p11 = scmp.lt.u32.totalorder %s2332_s18, %s2961_s1 }
  0x22   : > { %p1947_p7 = scmp.ne.s32.totalorder %s2332_s18, %s1946_s22  ;;  %p1953_p12 = scmp.lt.u32.totalorder %s1951_s16, %s1946_s22 }
  0x23   : > { %p1955_p0 = scmp.lt.u32.totalorder %s1946_s22, %s2332_s18 }
  0x24   : > { %p1949_p9 = pnand %p2344_p8, %p1947_p7  ;;  %p1954_p13 = por %p1953_p12, %p1952_p11 }
  0x26   : > { %p1950_p10 = pneg %p1949_p9  ;;  %p1956_p2 = por %p1955_p0, %p1954_p13 }
  0x28   : > { %p1957_p3 = pnand %p1956_p2, %p1950_p10 }
  0x2a   : > { %1960 = shalt.err (!%p1957_p3)
}
  0x2b   : > { %s1961_s11 = scalar_lea.vmem %s2336_s20, 128  ;;  %s2216_s8 = smov [#allocation7]  }
  0x2c   : > { %p1962_p4 = scmp.ne.s32.totalorder %s2336_s20, %s1961_s11  ;;  %s1966_s9 = sshll.u32 %s2216_s8, 4  ;;  %s1967_s9 = int_to_ptr.vmem [resolvable:$false] %s1966_s9 }
  0x2d   : > { %s1968_s17 = scalar_lea.vmem %s1967_s9, 256  ;;  %p1969_p9 = scmp.lt.s32.totalorder %s2336_s20, %s1967_s9 }
  0x2e   : > { %p1964_p5 = pnand %p1962_p4, %p2344_p8  ;;  %p1970_p1 = scmp.lt.s32.totalorder %s1968_s17, %s1961_s11 }
  0x30   : > { %p1965_p7 = pneg %p1964_p5  ;;  %p1971_p11 = por %p1970_p1, %p1969_p9 }
  0x32   : > { %p1972_p12 = pnand %p1971_p11, %p1965_p7 }
  0x34   : > { %1975 = shalt.err (!%p1972_p12)
}
  0x35   : > { %s2930_s22 = smov 64   ;;  %s2932_s16 = smov 4  }
  0x36   : > { %1821 = dma.hbm_to_vmem [thread:$0]  (!%p2321_p6), %s2332_s18, 128, %s2336_s20, %s2338_s21, %s2930_s22, %s2930_s22, %s2932_s16  }
  0x37   : > { %s2376_s8 = scalar_lea.hbm %s2922_s2, %s1578_s15  ;;  %s2379_s9 = sadd.s32 4294967295, %s2214_s29  }
  0x38   : > { %s2929_s17 = sadd.s32 4294967294, %s2214_s29   ;;  %p63_p1 = scmp.ne.s32.totalorder %s2198_s25, %s2194_s24 }
  0x39   : > { %p2941_p10 = scmp.eq.s32.totalorder %s2379_s9, 0  ;;  %p185_p13 = scmp.eq.s32.totalorder %s2379_s9, 2 }
  0x3a   : > { %p191_p0 = scmp.eq.s32.totalorder %s2929_s17, 2  ;;  %p1499_p2 = scmp.ge.s32.totalorder %s2214_s29, 1 }
  0x3b   : > { %p2391_p3 = por %p2941_p10, %p63_p1  ;;  %p2964_p4 = scmp.ne.s32.totalorder %s2202_s26, %s2198_s25 }
  0x3c   : > { %p2402_p7 = por %p191_p0, %p63_p1  ;;  %p250_p9 = scmp.lt.s32.totalorder %s2214_s29, 4 }
  0x3d   : > { %s2963_s18 = scalar_select %p2391_p3, 1, 0 }
  0x3e   : > { %p2398_p5 = por %p185_p13, %p2964_p4  ;;  %p2407_p11 = pnand %p1499_p2, %p250_p9 }
  0x3f   : > { %s2966_s20 = scalar_select %p2402_p7, 1, 0 }
  0x40   : > { %s2965_s15 = scalar_select %p2398_p5, 1, 0 }
  0x41   : > { %2967 = sst [smem:[#allocation27_spill]] %s2966_s20  ;;  %s2219_s11 = smov [#allocation10]  }
  0x42   : > { %s2968_s19 = scalar_select %p2407_p11, 1, 0 }
  0x43   : > { %s262_s17 = sshll.u32 %s2219_s11, 4  ;;  %s321_s22 = scalar_lea.vmem [#allocation9], %s1503_s14  ;;  %s2413_s17 = int_to_ptr.vmem [resolvable:$true] %s262_s17 }
  0x44   : > { %s330_s16 = sshll.u32 %s321_s22, 4  ;;  %p1811_p12 = pneg %p2407_p11  ;;  %s2432_s16 = int_to_ptr.vmem [resolvable:$true] %s330_s16 }
  0x45   : > { %s1502_s1 = sshll.u32 %s2210_s28, 4  ;;  %s282_s30 = scalar_lea.vmem [#allocation4], %s2315_s10 }
  0x46   : > { %s289_s12 = sshll.u32 %s282_s30, 4  ;;  %p2421_p1 = pnand %p1811_p12, %p2941_p10  ;;  %s2430_s12 = int_to_ptr.vmem [resolvable:$true] %s289_s12 }
  0x47   : > { %s2428_s11 = scalar_lea.hbm %s2920_s0, %s1502_s1  ;;  %s1976_s28 = scalar_lea.hbm %s2923_s3, 1024 }
  0x48   : > { %p1977_p13 = scmp.ne.s32.totalorder %s2923_s3, %s1976_s28  ;;  %p1978_p0 = pneg %p2421_p1 }
  0x49   : > { %p1983_p9 = scmp.lt.u32.totalorder %s1976_s28, %s2923_s3 }
  0x4a   : > { %p1979_p2 = pnand %p1978_p0, %p1977_p13 }
  0x4c   : > { %p1980_p4 = pneg %p1979_p2 }
  0x4e   : > { %p1985_p12 = pnand %p1983_p9, %p1980_p4 }
  0x50   : > { %1988 = shalt.err (!%p1985_p12)
}
  0x51   : > { %s1989_s1 = scalar_lea.vmem %s2413_s17, 1024  ;;  %p1997_p3 = scmp.lt.s32.totalorder %s2413_s17, %s2413_s17 }
  0x52   : > { %p1990_p10 = scmp.ne.s32.totalorder %s2413_s17, %s1989_s1  ;;  %p1998_p11 = scmp.lt.s32.totalorder %s1989_s1, %s1989_s1 }
  0x54   : > { %p1992_p7 = pnand %p1990_p10, %p1978_p0  ;;  %p1999_p6 = por %p1998_p11, %p1997_p3 }
  0x56   : > { %p1993_p5 = pneg %p1992_p7 }
  0x58   : > { %p2000_p8 = pnand %p1999_p6, %p1993_p5 }
  0x5a   : > { %2003 = shalt.err (!%p2000_p8)
}
  0x5b   : > { %s2970_s29 = smov 4   ;;  %s2971_s14 = smov 64  }
  0x5c   : > { %1814 = dma.hbm_to_vmem [thread:$0]  (!%p2421_p1), %s2923_s3, 1024, %s2413_s17, [#allocation11], %s2971_s14, %s2971_s14, %s2970_s29  }
  0x5d   : > { %s280_s30 = scalar_lea.sflag [#allocation5], %s2315_s10  ;;  %s2004_s24 = scalar_lea.hbm %s2428_s11, 16 }
  0x5e   : > { %p2005_p6 = scmp.ne.s32.totalorder %s2428_s11, %s2004_s24  ;;  %p2972_p8 = scmp.ne.s32.totalorder %s2962_s23, 0 }
  0x5f   : > { %s2009_s1 = scalar_lea.hbm %s2920_s0, 48  ;;  %p2010_p5 = scmp.lt.u32.totalorder %s2428_s11, %s2920_s0 }
  0x60   : > { %p2007_p10 = pnand %p2005_p6, %p2972_p8  ;;  %p2011_p7 = scmp.lt.u32.totalorder %s2009_s1, %s2004_s24 }
  0x61   : > { %p2013_p13 = scmp.lt.u32.totalorder %s2004_s24, %s2428_s11 }
  0x62   : > { %p2008_p3 = pneg %p2007_p10  ;;  %p2012_p11 = por %p2011_p7, %p2010_p5 }
  0x64   : > { %p2014_p0 = por %p2013_p13, %p2012_p11 }
  0x66   : > { %p2015_p2 = pnand %p2014_p0, %p2008_p3 }
  0x68   : > { %2018 = shalt.err (!%p2015_p2)
}
  0x69   : > { %s2019_s10 = scalar_lea.vmem %s2430_s12, 16  ;;  %s2220_s17 = smov [#allocation4]  }
  0x6a   : > { %p2020_p1 = scmp.ne.s32.totalorder %s2430_s12, %s2019_s10  ;;  %s2024_s28 = sshll.u32 %s2220_s17, 4  ;;  %s2025_s28 = int_to_ptr.vmem [resolvable:$false] %s2024_s28 }
  0x6b   : > { %s2026_s5 = scalar_lea.vmem %s2025_s28, 32  ;;  %p2027_p12 = scmp.lt.s32.totalorder %s2430_s12, %s2025_s28 }
  0x6c   : > { %p2022_p4 = pnand %p2020_p1, %p2972_p8  ;;  %p2028_p6 = scmp.lt.s32.totalorder %s2026_s5, %s2019_s10 }
  0x6e   : > { %p2023_p9 = pneg %p2022_p4  ;;  %p2029_p10 = por %p2028_p6, %p2027_p12 }
  0x70   : > { %p2030_p5 = pnand %p2029_p10, %p2023_p9 }
  0x72   : > { %2033 = shalt.err (!%p2030_p5)
}
  0x73   : > { %p2973_p3 = scmp.ne.s32.totalorder %s2960_s13, 0  ;;  %s2034_s7 = scalar_lea.hbm %s2376_s8, 128 }
  0x74   : > { %p2035_p7 = scmp.ne.s32.totalorder %s2376_s8, %s2034_s7  ;;  %s2039_s26 = scalar_lea.hbm %s2922_s2, 384 }
  0x75   : > { %1818 = dma.hbm_to_vmem [thread:$0]  (!%p2973_p3), %s2428_s11, 16, %s2430_s12, %s280_s30  }
  0x76   : > { %p2037_p11 = pnand %p2035_p7, %p2972_p8  ;;  %p2040_p0 = scmp.lt.u32.totalorder %s2376_s8, %s2922_s2 }
  0x77   : > { %p2041_p2 = scmp.lt.u32.totalorder %s2039_s26, %s2034_s7  ;;  %p2043_p4 = scmp.lt.u32.totalorder %s2034_s7, %s2376_s8 }
  0x78   : > { %p2038_p13 = pneg %p2037_p11 }
  0x79   : > { %p2042_p1 = por %p2041_p2, %p2040_p0 }
  0x7b   : > { %p2044_p9 = por %p2043_p4, %p2042_p1 }
  0x7d   : > { %p2045_p12 = pnand %p2044_p9, %p2038_p13 }
  0x7f   : > { %2048 = shalt.err (!%p2045_p12)
}
  0x80   : > { %s2049_s12 = scalar_lea.vmem %s2432_s16, 128  ;;  %s2221_s11 = smov [#allocation9]  }
  0x81   : > { %p2050_p6 = scmp.ne.s32.totalorder %s2432_s16, %s2049_s12  ;;  %s2054_s30 = sshll.u32 %s2221_s11, 4  ;;  %s2055_s30 = int_to_ptr.vmem [resolvable:$false] %s2054_s30 }
  0x82   : > { %s2056_s10 = scalar_lea.vmem %s2055_s30, 256  ;;  %p2057_p7 = scmp.lt.s32.totalorder %s2432_s16, %s2055_s30 }
  0x83   : > { %p2052_p10 = pnand %p2050_p6, %p2972_p8  ;;  %p2058_p11 = scmp.lt.s32.totalorder %s2056_s10, %s2049_s12 }
  0x85   : > { %p2053_p5 = pneg %p2052_p10  ;;  %p2059_p0 = por %p2058_p11, %p2057_p7 }
  0x87   : > { %p2060_p2 = pnand %p2059_p0, %p2053_p5 }
  0x89   : > { %2063 = shalt.err (!%p2060_p2)
}
  0x8a   : > { %1824 = dma.hbm_to_vmem [thread:$0]  (!%p2973_p3), %s2376_s8, 128, %s2432_s16, %s2338_s21, %s2971_s14, %s2971_s14, %s2970_s29  }
  0x8b   : > { %p2974_p8 = scmp.ne.s32.totalorder %s2968_s19, 0 }
  0x8c   : > { %s2508_s23 = sand.u32 (!%p2974_p8), 1, %s2198_s25   ;;  %p2975_p13 = scmp.ne.s32.totalorder (!%p2974_p8), %s2963_s18, 0 }
  0x8d   : > { %342 = sbr.rel (%p2974_p8) target bundleno = 1021 (0x3fd), region = 40  ;;  %s345_s17 = scalar_lea.sflag (!%p2974_p8), [#allocation5], %s2508_s23 }
  0x8e   : > { %s347_s28 = scalar_lea.vmem (!%p2974_p8), [#allocation4], %s2508_s23 }
  0x94   : > { %2173 = dma.done.wait (%p2975_p13), %s345_s17, 16  }
  0x95   : > { %2175 = vsyncadd (%p2975_p13), %s345_s17, 4294967280  ;;  %s352_s13 = sand.u32 1, %s2379_s9   ;;  %s1510_s21 = sshll.u32 %s2508_s23, 3 }
  0x96   : > { %s353_s16 = scalar_lea.sflag [#allocation8], %s352_s13  ;;  %s2520_s8 = scalar_lea.vmem [#allocation7], %s1510_s21 }
  0x97   : > { %2177 = dma.done.wait (%p2975_p13), %s353_s16, 256  }
  0x98   : > { %2179 = vsyncadd (%p2975_p13), %s353_s16, 4294967040  ;;  %s2526_s19 = scalar_lea.vmem [#allocation9], %s1510_s21  ;;  %p2976_p3 = scmp.eq.s32.totalorder %s2379_s9, 0 }
  0x9a   : > { %2181 = dma.done.wait (%p2976_p3), [#allocation11], 1024   ;;  %p2977_p1 = pmov %p2976_p3 }
  0x9b   : > { %v2222_v0 = vmov 0.0   ;;  %vm2223_vm0 = vmmov 0   ;;  %v1896_v1 = vld [vmem:[#allocation10] sm:$0xff]   ;;  %v1897_v2 = vld [vmem:[#allocation10 + $0x8] sm:$0xff]   ;;  %v1898_v3 = vld [vmem:[#allocation10 + $0x10] sm:$0xff]   ;;  %v551_v10 = vlaneseq  ;;  %vm621_vm2 = vcmask 130048  }
  0x9c   : > { %2183 = vsyncadd (%p2977_p1), [#allocation11], 4294966272  ;;  %1644 = vmatprep.subr.bf16.mxu0 %v2222_v0  ;;  %1660 = vmatprep.mubr.msk.bf16.mxu0 %vm2223_vm0, %v2222_v0  ;;  %v1899_v4 = vld [vmem:[#allocation10 + $0x18] sm:$0xff]   ;;  %v1900_v5 = vld [vmem:[#allocation10 + $0x20] sm:$0xff]   ;;  %s1514_s14 = sshll.u32 %s2508_s23, 7  ;;  %s1581_s7 = sshll.u32 %s2206_s27, 11 }
  0x9d   : > { %1645 = vmatpush3.bf16.xpose.msra.mxu0 %v1896_v1  ;;  %v1901_v6 = vld [vmem:[#allocation10 + $0x28] sm:$0xff]   ;;  %v1902_v7 = vld [vmem:[#allocation10 + $0x30] sm:$0xff]   ;;  %v1903_v8 = vld [vmem:[#allocation10 + $0x38] sm:$0xff]   ;;  %v2546_v11 = vshrl.u32 %v551_v10, 7  ;;  %s2705_s5 = scalar_lea.vmem [#allocation13], %s1514_s14  ;;  %s2795_s26 = scalar_lea.hbm %s2926_s6, %s1581_s7 }
  0x9e   : > { %1646 = vmatprep.subr.bf16.mxu0 %v2222_v0  ;;  %v1904_v9 = vld [vmem:[%s2520_s8] sm:$0xff]   ;;  %v2550_v12 = vld [vmem:[%s347_s28] ss:$0 sm:$0xff]  ;;  %v1907_v49 = vld [vmem:[#allocation10 + $0x10] sm:$0xff]   ;;  %s1290_s20 = sshll.u32 %s2705_s5, 4  ;;  %s2802_s1 = scalar_lea.sflag [#allocation14], %s352_s13  ;;  %s2798_s20 = int_to_ptr.vmem [resolvable:$true] %s1290_s20 }
  0x9f   : > { %vm573_vm1 = vcmp.eq.s32.totalorder %v2550_v12, %v2546_v11  ;;  %v553_v14 = vadd.s32 8, %v2546_v11  ;;  %v554_v15 = vadd.s32 16, %v2546_v11  ;;  %v555_v16 = vadd.s32 24, %v2546_v11  ;;  %v1905_v25 = vld [vmem:[#allocation10] sm:$0xff]   ;;  %v1906_v36 = vld [vmem:[#allocation10 + $0x8] sm:$0xff]   ;;  %v1908_v59 = vld [vmem:[#allocation10 + $0x18] sm:$0xff]  }
  0xa0   : > { %v1526_v13 = vsel %vm573_vm1, 1.0, %v2222_v0  ;;  %v556_v17 = vadd.s32 32, %v2546_v11  ;;  %v557_v19 = vadd.s32 40, %v2546_v11  ;;  %v558_v20 = vadd.s32 48, %v2546_v11  ;;  %v1909_v1 = vld [vmem:[#allocation10 + $0x20] sm:$0xff]   ;;  %s2064_s12 = scalar_lea.vmem %s2798_s20, 2048 }
  0xa1   : > { %1668 = vmatprep.mubr.msk.f32.mxu1 %vm621_vm2, %v1526_v13  ;;  %vm574_vm3 = vcmp.eq.s32.totalorder %v2550_v12, %v553_v14  ;;  %vm575_vm4 = vcmp.eq.s32.totalorder %v2550_v12, %v554_v15  ;;  %v622_v18 = vsel %vm621_vm2, %v1526_v13, 0.0  ;;  %vm576_vm5 = vcmp.eq.s32.totalorder %v2550_v12, %v555_v16  ;;  %p2065_p4 = scmp.ne.s32.totalorder %s2798_s20, %s2064_s12  ;;  %p2978_p9 = scmp.ne.s32.totalorder %s2965_s15, 0 }
  0xa2   : > { %623 = vadd.xlane.f32.xlu0 %v622_v18  ;;  %vm577_vm6 = vcmp.eq.s32.totalorder %v2550_v12, %v556_v17  ;;  %v2568_v21 = vsel %vm574_vm3, 1.0, %v2222_v0  ;;  %v2571_v22 = vsel %vm575_vm4, 1.0, %v2222_v0  ;;  %v2578_v26 = vsel %vm576_vm5, 1.0, %v2222_v0  ;;  %s2226_s11 = smov [#allocation13]  }
  0xa3   : > { %v625_v23 = vsel %vm621_vm2, %v2568_v21, 0.0  ;;  %v628_v24 = vsel %vm621_vm2, %v2571_v22, 0.0  ;;  %v2581_v27 = vsel %vm577_vm6, 1.0, %v2222_v0  ;;  %vm578_vm7 = vcmp.eq.s32.totalorder %v2550_v12, %v557_v19  ;;  %p2066_p12 = pnand %p2065_p4, %p2978_p9  ;;  %s2068_s30 = sshll.u32 %s2226_s11, 4  ;;  %s2069_s30 = int_to_ptr.vmem [resolvable:$false] %s2068_s30 }
  0xa4   : > { %v559_v28 = vadd.s32 56, %v2546_v11  ;;  %629 = vadd.xlane.f32.xlu1 %v628_v24  ;;  %vm579_vm8 = vcmp.eq.s32.totalorder %v2550_v12, %v558_v20  ;;  %v560_v29 = vadd.s32 64, %v2546_v11  ;;  %v631_v30 = vsel %vm621_vm2, %v2578_v26, 0.0  ;;  %s2070_s10 = scalar_lea.vmem %s2069_s30, 4096  ;;  %p2071_p10 = scmp.lt.s32.totalorder %s2798_s20, %s2069_s30 }
  0xa5   : > { %1647 = vmatpush3.bf16.xpose.msra.mxu0 %v1897_v2  ;;  %v634_v31 = vsel %vm621_vm2, %v2581_v27, 0.0  ;;  %v2593_v32 = vsel %vm578_vm7, 1.0, %v2222_v0  ;;  %v2596_v33 = vsel %vm579_vm8, 1.0, %v2222_v0  ;;  %v561_v34 = vadd.s32 72, %v2546_v11  ;;  %v1910_v2 = vld [vmem:[#allocation10 + $0x28] sm:$0xff]   ;;  %p2067_p6 = pneg %p2066_p12  ;;  %p2072_p5 = scmp.lt.s32.totalorder %s2070_s10, %s2064_s12 }
  0xa6   : > { %1648 = vmatprep.subr.bf16.mxu0 %v2222_v0  ;;  %626 = vadd.xlane.f32.xlu0 %v625_v23  ;;  %vm580_vm9 = vcmp.eq.s32.totalorder %v2550_v12, %v559_v28  ;;  %vm581_vm10 = vcmp.eq.s32.totalorder %v2550_v12, %v560_v29  ;;  %v562_v35 = vadd.s32 80, %v2546_v11  ;;  %v637_v37 = vsel %vm621_vm2, %v2593_v32, 0.0 }
  0xa7   : > { %v640_v38 = vsel %vm621_vm2, %v2596_v33, 0.0  ;;  %v2607_v39 = vsel %vm580_vm9, 1.0, %v2222_v0  ;;  %v2610_v40 = vsel %vm581_vm10, 1.0, %v2222_v0  ;;  %vm582_vm11 = vcmp.eq.s32.totalorder %v2550_v12, %v561_v34  ;;  %p2073_p7 = por %p2072_p5, %p2071_p10 }
  0xa8   : > { %632 = vadd.xlane.f32.xlu1 %v631_v30  ;;  %v563_v41 = vadd.s32 88, %v2546_v11  ;;  %vm583_vm12 = vcmp.eq.s32.totalorder %v2550_v12, %v562_v35  ;;  %v564_v42 = vadd.s32 96, %v2546_v11  ;;  %v643_v43 = vsel %vm621_vm2, %v2607_v39, 0.0 }
  0xa9   : > { %v646_v44 = vsel %vm621_vm2, %v2610_v40, 0.0  ;;  %v2622_v45 = vsel %vm582_vm11, 1.0, %v2222_v0  ;;  %v2625_v46 = vsel %vm583_vm12, 1.0, %v2222_v0  ;;  %v565_v47 = vadd.s32 104, %v2546_v11  ;;  %p2074_p11 = pnand %p2073_p7, %p2067_p6 }
  0xaa   : > { %635 = vadd.xlane.f32.xlu0 %v634_v31  ;;  %vm584_vm13 = vcmp.eq.s32.totalorder %v2550_v12, %v563_v41  ;;  %vm585_vm14 = vcmp.eq.s32.totalorder %v2550_v12, %v564_v42  ;;  %v566_v48 = vadd.s32 112, %v2546_v11  ;;  %v649_v50 = vsel %vm621_vm2, %v2622_v45, 0.0 }
  0xab   : > { %v652_v51 = vsel %vm621_vm2, %v2625_v46, 0.0  ;;  %v2636_v52 = vsel %vm584_vm13, 1.0, %v2222_v0  ;;  %v2639_v53 = vsel %vm585_vm14, 1.0, %v2222_v0  ;;  %vm586_vm15 = vcmp.eq.s32.totalorder %v2550_v12, %v565_v47 }
  0xac   : > { %638 = vadd.xlane.f32.xlu1 %v637_v37  ;;  %vm587_vm1 = vcmp.eq.s32.totalorder %v2550_v12, %v566_v48  ;;  %v567_v54 = vadd.s32 120, %v2546_v11  ;;  %v655_v55 = vsel %vm621_vm2, %v2636_v52, 0.0  ;;  %v658_v56 = vsel %vm621_vm2, %v2639_v53, 0.0 }
  0xad   : > { %1649 = vmatpush3.bf16.xpose.msra.mxu0 %v1898_v3  ;;  %v1539_v57 = vsel %vm586_vm15, 1.0, %v2222_v0  ;;  %v1540_v58 = vsel %vm587_vm1, 1.0, %v2222_v0  ;;  %v1911_v3 = vld [vmem:[#allocation10 + $0x30] sm:$0xff]   ;;  %v2224_v18 = vmov 0.0|0.0  }
  0xae   : > { %1650 = vmatprep.subr.bf16.mxu0 %v2222_v0  ;;  %641 = vadd.xlane.f32.xlu0 %v640_v38  ;;  %vm588_vm3 = vcmp.eq.s32.totalorder %v2550_v12, %v567_v54  ;;  %v661_v60 = vsel %vm621_vm2, %v1539_v57, 0.0  ;;  %v664_v61 = vsel %vm621_vm2, %v1540_v58, 0.0 }
  0xaf   : > { %v1541_v62 = vsel %vm588_vm3, 1.0, %v2222_v0 }
  0xb0   : > { %644 = vadd.xlane.f32.xlu1 %v643_v43  ;;  %v667_v63 = vsel %vm621_vm2, %v1541_v62, 0.0 }
  0xb2   : > { %647 = vadd.xlane.f32.xlu0 %v646_v44 }
  0xb4   : > { %650 = vadd.xlane.f32.xlu1 %v649_v50 }
  0xb5   : > { %1651 = vmatpush3.bf16.xpose.msra.mxu0 %v1899_v4  ;;  %v1912_v4 = vld [vmem:[#allocation10 + $0x38] sm:$0xff]  }
  0xb6   : > { %1652 = vmatprep.subr.bf16.mxu0 %v2222_v0  ;;  %653 = vadd.xlane.f32.xlu0 %v652_v51 }
  0xb8   : > { %656 = vadd.xlane.f32.xlu1 %v655_v55 }
  0xba   : > { %659 = vadd.xlane.f32.xlu0 %v658_v56 }
  0xbc   : > { %662 = vadd.xlane.f32.xlu1 %v661_v60 }
  0xbd   : > { %1653 = vmatpush3.bf16.xpose.msra.mxu0 %v1900_v5  ;;  %v1913_v5 = vld [vmem:[%s2526_s19] sm:$0xff]  }
  0xbe   : > { %1654 = vmatprep.subr.bf16.mxu0 %v2222_v0  ;;  %665 = vadd.xlane.f32.xlu0 %v664_v61 }
  0xc0   : > { %668 = vadd.xlane.f32.xlu1 %v667_v63 }
  0xc5   : > { %1655 = vmatpush3.bf16.xpose.msra.mxu0 %v1901_v6  ;;  %v1515_v6 = vld [vmem:[%s2924_s4] ss:$0 sm:$0xff] }
  0xc6   : > { %1656 = vmatprep.subr.bf16.mxu0 %v2222_v0 }
  0xcd   : > { %1657 = vmatpush3.bf16.xpose.msra.mxu0 %v1902_v7 }
  0xce   : > { %1658 = vmatprep.subr.bf16.mxu0 %v2222_v0 }
  0xd5   : > { %1659 = vmatpush3.bf16.xpose.msra.mxu0 %v1903_v8 }
  0xd6   : > { %1727 = vmatprep.subr.bf16.mxu0 %v2222_v0 }
  0xdc   : > { %1661 = vmatmul.mubr.bf16.vlgmr.msra.gmra.mrb[0].mxu0 %v1904_v9 }
  0xdd   : > { %1743 = vmatprep.mubr.msk.bf16.mxu0 %vm2223_vm0, %v2222_v0  ;;  %1728 = vmatpush3.bf16.xpose.msra.mxu0 %v1905_v25 }
  0xde   : > { %1729 = vmatprep.subr.bf16.mxu0 %v2222_v0 }
  0xe5   : > { %1730 = vmatpush3.bf16.xpose.msra.mxu0 %v1906_v36 }
  0xe6   : > { %1731 = vmatprep.subr.bf16.mxu0 %v2222_v0 }
  0xed   : > { %1732 = vmatpush3.bf16.xpose.msra.mxu0 %v1907_v49 }
  0xee   : > { %1733 = vmatprep.subr.bf16.mxu0 %v2222_v0 }
  0xf5   : > { %1734 = vmatpush3.bf16.xpose.msra.mxu0 %v1908_v59 }
  0xf6   : > { %1735 = vmatprep.subr.bf16.mxu0 %v2222_v0 }
  0xfd   : > { %1736 = vmatpush3.bf16.xpose.msra.mxu0 %v1909_v1 }
  0xfe   : > { %1737 = vmatprep.subr.bf16.mxu0 %v2222_v0 }
 0x105   : > { %1738 = vmatpush3.bf16.xpose.msra.mxu0 %v1910_v2 }
 0x106   : > { %1739 = vmatprep.subr.bf16.mxu0 %v2222_v0 }
 0x10d   : > { %1740 = vmatpush3.bf16.xpose.msra.mxu0 %v1911_v3 }
 0x10e   : > { %1741 = vmatprep.subr.bf16.mxu0 %v2222_v0 }
 0x115   : > { %1742 = vmatpush3.bf16.xpose.msra.mxu0 %v1912_v4 }
 0x11c   : > { %1744 = vmatmul.mubr.bf16.vlgmr.msra.gmra.mrb[4].mxu0 %v1913_v5 }
 0x12f   : > { %v624_v19 = vpop.xlane.xlu0 %623 }
 0x130   : > { %v670_v24 = vmax.f32 %v624_v19, 1.0 }
 0x131   : > { %v630_v20 = vpop.xlane.xlu1 %629 }
 0x135   : > { %v633_v23 = vpop.xlane.xlu1 %632 }
 0x136   : > { %v673_v25 = vmax.f32 %v633_v23, 1.0 }
 0x1af   : > { %v538_v7 = vpop.f32.mrb[0].mxu0 }
 0x1b0   : > { %v539_v8 = vadd.f32 %v1515_v6, %v538_v7  ;;  %v1662_v9 = vpop.f32.mrb[1].mxu0 }
 0x1b1   : > { %v541_v10 = vpop.f32.mrb[2].mxu0 }
 0x1b2   : > { %v547_v11 = vmul.f32 0.01, %v539_v8  ;;  %v542_v12 = vadd.f32 %v1515_v6, %v541_v10  ;;  %v1663_v13 = vpop.f32.mrb[3].mxu0  ;;  %vm545_vm4 = vcmp.gt.f32.partialorder %v539_v8, 0.0 }
 0x1b4   : > { %v548_v14 = vmul.f32 0.01, %v542_v12  ;;  %vm546_vm5 = vcmp.gt.f32.partialorder %v542_v12, 0.0  ;;  %v549_v15 = vsel %vm545_vm4, %v539_v8, %v547_v11 }
 0x1b6   : > { %v550_v16 = vsel %vm546_vm5, %v542_v12, %v548_v14 }
 0x1b7   : > { %v1767_v17 = vpack.c.bf16 %v550_v16, %v549_v15 }
 0x1b9   : > { %1768 = vmatprep.subr.bf16.mxu1 %v1767_v17 }
 0x1ba   : > { %1770 = vmatpush3.bf16.msra.mxu1 %v1767_v17 }
 0x1bb   : > { %1771 = vmatprep.subr.bf16.mxu1 %v2224_v18 }
 0x1bd   : > { %1669 = vmatmul.mubr.msk.f32.vlgmr.msra.gmra.mrb[0].mxu1 %vm621_vm2, %v2568_v21  ;;  %v627_v21 = vpop.xlane.xlu0 %626 }
 0x1be   : > { %1671 = vmatprep.mubr.msk.f32.mxu1 %vm621_vm2, %v2571_v22  ;;  %v671_v22 = vmax.f32 %v627_v21, 1.0 }
 0x1c0   : > { %1914 = vrcp.f32 %v671_v22 }
 0x1c1   : > { %1672 = vmatmul.mubr.msk.f32.gmra.mrb[2].mxu1 %vm621_vm2, %v2578_v26  ;;  %v639_v26 = vpop.xlane.xlu1 %638  ;;  %v636_v28 = vpop.xlane.xlu0 %635  ;;  %1916 = vrcp.f32 %v670_v24 }
 0x1c2   : > { %1674 = vmatprep.mubr.msk.f32.mxu1 %vm621_vm2, %v2581_v27  ;;  %v672_v27 = vmax.f32 %v630_v20, 1.0  ;;  %v675_v29 = vmax.f32 %v639_v26, 1.0  ;;  %1918 = vrcp.f32 %v673_v25  ;;  %v674_v30 = vmax.f32 %v636_v28, 1.0 }
 0x1c4   : > { %1920 = vrcp.f32 %v672_v27 }
 0x1c5   : > { %1675 = vmatmul.mubr.msk.f32.gmra.mrb[4].mxu1 %vm621_vm2, %v2593_v32  ;;  %v645_v32 = vpop.xlane.xlu1 %644  ;;  %v642_v35 = vpop.xlane.xlu0 %641  ;;  %1922 = vrcp.f32 %v675_v29 }
 0x1c6   : > { %1677 = vmatprep.mubr.msk.f32.mxu1 %vm621_vm2, %v2596_v33  ;;  %1924 = vrcp.f32 %v674_v30  ;;  %v676_v41 = vmax.f32 %v642_v35, 1.0 }
 0x1c9   : > { %1678 = vmatmul.mubr.msk.f32.gmra.mrb[6].mxu1 %vm621_vm2, %v2607_v39  ;;  %v651_v42 = vpop.xlane.xlu1 %650 }
 0x1ca   : > { %1680 = vmatprep.mubr.msk.f32.mxu1 %vm621_vm2, %v2610_v40  ;;  %v677_v40 = vmax.f32 %v645_v32, 1.0  ;;  %v679_v49 = vmax.f32 %v651_v42, 1.0 }
 0x1cc   : > { %1926 = vrcp.f32 %v677_v40 }
 0x1cd   : > { %1681 = vmatmul.mubr.msk.f32.gmra.mrb[8].mxu1 %vm621_vm2, %v2622_v45  ;;  %v1915_v45 = vpop.eup %1914  ;;  %1928 = vrcp.f32 %v676_v41  ;;  %v657_v55 = vpop.xlane.xlu1 %656 }
 0x1ce   : > { %1683 = vmatprep.mubr.msk.f32.mxu1 %vm621_vm2, %v2625_v46  ;;  %v648_v46 = vpop.xlane.xlu0 %647  ;;  %v1917_v51 = vpop.eup %1916  ;;  %1930 = vrcp.f32 %v679_v49  ;;  %v681_v2 = vmax.f32 %v657_v55, 1.0 }
 0x1cf   : > { %v678_v54 = vmax.f32 %v648_v46, 1.0  ;;  %v1919_v56 = vpop.eup %1918 }
 0x1d0   : > { %v1921_v59 = vpop.eup %1920 }
 0x1d1   : > { %1684 = vmatmul.mubr.msk.f32.gmra.mrb[10].mxu1 %vm621_vm2, %v2636_v52  ;;  %v1923_v3 = vpop.eup %1922  ;;  %1932 = vrcp.f32 %v678_v54  ;;  %v663_v7 = vpop.xlane.xlu1 %662 }
 0x1d2   : > { %1686 = vmatprep.mubr.msk.f32.mxu1 %vm621_vm2, %v2639_v53  ;;  %v1925_v8 = vpop.eup %1924  ;;  %1934 = vrcp.f32 %v681_v2  ;;  %v683_v19 = vmax.f32 %v663_v7, 1.0 }
 0x1d5   : > { %1687 = vmatmul.mubr.msk.f32.gmra.mrb[12].mxu1 %vm621_vm2, %v1539_v57  ;;  %v669_v23 = vpop.xlane.xlu1 %668 }
 0x1d6   : > { %1689 = vmatprep.mubr.msk.f32.mxu1 %vm621_vm2, %v1540_v58  ;;  %v654_v58 = vpop.xlane.xlu0 %653  ;;  %v1927_v24 = vpop.eup %1926  ;;  %v685_v35 = vmax.f32 %v669_v23, 1.0 }
 0x1d7   : > { %v1929_v29 = vpop.eup %1928 }
 0x1d9   : > { %1690 = vmatmul.mubr.msk.f32.gmra.mrb[14].mxu1 %vm621_vm2, %v1541_v62 }
 0x1da   : > { %1724 = vmatprep.mubr.msk.f32.mxu1 %vm2223_vm0, %v2222_v0  ;;  %v660_v12 = vpop.xlane.xlu0 %659 }
 0x1db   : > { %v682_v22 = vmax.f32 %v660_v12, 1.0 }
 0x1de   : > { %v666_v28 = vpop.xlane.xlu0 %665 }
 0x1ef   : > { %v1177_v31 = vpop.f32.mrb[4].mxu0 }
 0x1f0   : > { %v1178_v33 = vadd.f32 %v1515_v6, %v1177_v31  ;;  %v1745_v34 = vpop.f32.mrb[5].mxu0 }
 0x1f1   : > { %v1180_v36 = vpop.f32.mrb[6].mxu0 }
 0x1f2   : > { %vm1184_vm2 = vcmp.gt.f32.partialorder %v1178_v33, 0.0  ;;  %v1186_v37 = vmul.f32 0.01, %v1178_v33  ;;  %v1181_v38 = vadd.f32 %v1515_v6, %v1180_v36  ;;  %v1746_v39 = vpop.f32.mrb[7].mxu0  ;;  %v680_v6 = vmax.f32 %v654_v58, 1.0 }
 0x1f3   : > { %v1931_v39 = vpop.eup %1930 }
 0x1f4   : > { %v2694_v43 = vsel %vm1184_vm2, %v1178_v33, %v1186_v37  ;;  %vm1185_vm6 = vcmp.gt.f32.partialorder %v1181_v38, 0.0  ;;  %v1187_v44 = vmul.f32 0.01, %v1181_v38  ;;  %1936 = vrcp.f32 %v680_v6 }
 0x1f5   : > { %1938 = vrcp.f32 %v683_v19 }
 0x1f6   : > { %v2697_v47 = vsel %vm1185_vm6, %v1181_v38, %v1187_v44  ;;  %1940 = vrcp.f32 %v682_v22  ;;  %v684_v38 = vmax.f32 %v666_v28, 1.0  ;;  %v1933_v44 = vpop.eup %1932 }
 0x1f7   : > { %v1190_v50 = vpack.c.bf16 %v2697_v47, %v2694_v43  ;;  %1942 = vrcp.f32 %v685_v35  ;;  %v1935_v54 = vpop.eup %1934 }
 0x1f8   : > { %1944 = vrcp.f32 %v684_v38 }
 0x1fe   : > { %v1937_v58 = vpop.eup %1936 }
 0x290   : > { %v1670_v48 = vpop.f32.mrb[0].mxu1 }
 0x291   : > { %v912_v52 = vmul.f32 %v1915_v45, %v1670_v48  ;;  %v832_v53 = vpop.f32.mrb[1].mxu1 }
 0x292   : > { %v911_v57 = vmul.f32 %v1917_v51, %v832_v53 }
 0x293   : > { %v2701_v60 = vmul.f32 2.0, %v912_v52  ;;  %v944_v61 = vmul.f32 %v912_v52, %v912_v52 }
 0x294   : > { %v2703_v62 = vmul.f32 2.0, %v911_v57  ;;  %v943_v63 = vmul.f32 %v911_v57, %v911_v57  ;;  %v1673_v1 = vpop.f32.mrb[2].mxu1 }
 0x295   : > { %1031 = vst [vmem:[%s2705_s5 + $0x8] sm:$0xff] %v2701_v60  ;;  %v914_v4 = vmul.f32 %v1919_v56, %v1673_v1  ;;  %v842_v5 = vpop.f32.mrb[3].mxu1 }
 0x296   : > { %v1772_v9 = vpack.c.bf16 %v944_v61, %v943_v63  ;;  %1030 = vst [vmem:[%s2705_s5] sm:$0xff] %v2703_v62  ;;  %v1047_v10 = vpack.c.bf16 %v2701_v60, %v2703_v62  ;;  %v913_v11 = vmul.f32 %v1921_v59, %v842_v5  ;;  %v1939_v5 = vpop.eup %1938 }
 0x297   : > { %v2713_v13 = vmul.f32 2.0, %v914_v4  ;;  %v946_v14 = vmul.f32 %v914_v4, %v914_v4 }
 0x298   : > { %v2715_v15 = vmul.f32 2.0, %v913_v11  ;;  %v945_v16 = vmul.f32 %v913_v11, %v913_v11  ;;  %1773 = vmatpush3.bf16.xpose.msra.mxu1 %v1772_v9  ;;  %v1676_v17 = vpop.f32.mrb[4].mxu1  ;;  %v1941_v9 = vpop.eup %1940 }
 0x299   : > { %1033 = vst [vmem:[%s2705_s5 + $0x18] sm:$0xff] %v2713_v13  ;;  %v916_v20 = vmul.f32 %v1923_v3, %v1676_v17  ;;  %1774 = vmatprep.subr.bf16.mxu1 %v2224_v18  ;;  %v852_v21 = vpop.f32.mrb[5].mxu1 }
 0x29a   : > { %v1775_v25 = vpack.c.bf16 %v946_v14, %v945_v16  ;;  %1032 = vst [vmem:[%s2705_s5 + $0x10] sm:$0xff] %v2715_v15  ;;  %v1048_v26 = vpack.c.bf16 %v2713_v13, %v2715_v15  ;;  %v915_v27 = vmul.f32 %v1925_v8, %v852_v21  ;;  %v1943_v21 = vpop.eup %1942 }
 0x29b   : > { %v2724_v30 = vmul.f32 2.0, %v916_v20  ;;  %v948_v31 = vmul.f32 %v916_v20, %v916_v20 }
 0x29c   : > { %v2726_v32 = vmul.f32 2.0, %v915_v27  ;;  %v947_v33 = vmul.f32 %v915_v27, %v915_v27  ;;  %v1679_v34 = vpop.f32.mrb[6].mxu1 }
 0x29d   : > { %1035 = vst [vmem:[%s2705_s5 + $0x28] sm:$0xff] %v2724_v30  ;;  %v918_v36 = vmul.f32 %v1927_v24, %v1679_v34  ;;  %v862_v37 = vpop.f32.mrb[7].mxu1 }
 0x29e   : > { %v1778_v40 = vpack.c.bf16 %v948_v31, %v947_v33  ;;  %1034 = vst [vmem:[%s2705_s5 + $0x20] sm:$0xff] %v2726_v32  ;;  %v1049_v41 = vpack.c.bf16 %v2724_v30, %v2726_v32  ;;  %v917_v42 = vmul.f32 %v1929_v29, %v862_v37 }
 0x29f   : > { %v2734_v45 = vmul.f32 2.0, %v918_v36  ;;  %v950_v46 = vmul.f32 %v918_v36, %v918_v36 }
 0x2a0   : > { %1776 = vmatpush3.bf16.xpose.msra.mxu1 %v1775_v25  ;;  %v2736_v48 = vmul.f32 2.0, %v917_v42  ;;  %v949_v49 = vmul.f32 %v917_v42, %v917_v42  ;;  %v1682_v51 = vpop.f32.mrb[8].mxu1  ;;  %v1945_v25 = vpop.eup %1944 }
 0x2a1   : > { %1037 = vst [vmem:[%s2705_s5 + $0x38] sm:$0xff] %v2734_v45  ;;  %1777 = vmatprep.subr.bf16.mxu1 %v2224_v18  ;;  %v920_v52 = vmul.f32 %v1931_v39, %v1682_v51  ;;  %v872_v53 = vpop.f32.mrb[9].mxu1  ;;  %v2225_v51 = vmov 1.0  }
 0x2a2   : > { %v1781_v55 = vpack.c.bf16 %v950_v46, %v949_v49  ;;  %1036 = vst [vmem:[%s2705_s5 + $0x30] sm:$0xff] %v2736_v48  ;;  %v1050_v56 = vpack.c.bf16 %v2734_v45, %v2736_v48  ;;  %v919_v57 = vmul.f32 %v1933_v44, %v872_v53 }
 0x2a3   : > { %v2745_v59 = vmul.f32 2.0, %v920_v52  ;;  %v952_v61 = vmul.f32 %v920_v52, %v920_v52 }
 0x2a4   : > { %v2747_v63 = vmul.f32 2.0, %v919_v57  ;;  %v951_v1 = vmul.f32 %v919_v57, %v919_v57  ;;  %v1685_v2 = vpop.f32.mrb[10].mxu1 }
 0x2a5   : > { %1039 = vst [vmem:[%s2705_s5 + $0x48] sm:$0xff] %v2745_v59  ;;  %v922_v3 = vmul.f32 %v1935_v54, %v1685_v2  ;;  %v882_v4 = vpop.f32.mrb[11].mxu1 }
 0x2a6   : > { %v1784_v6 = vpack.c.bf16 %v952_v61, %v951_v1  ;;  %1038 = vst [vmem:[%s2705_s5 + $0x40] sm:$0xff] %v2747_v63  ;;  %v1051_v7 = vpack.c.bf16 %v2745_v59, %v2747_v63  ;;  %v921_v8 = vmul.f32 %v1937_v58, %v882_v4 }
 0x2a7   : > { %v938_v11 = vmul.f32 2.0, %v922_v3  ;;  %v954_v12 = vmul.f32 %v922_v3, %v922_v3 }
 0x2a8   : > { %1779 = vmatpush3.bf16.xpose.msra.mxu1 %v1778_v40  ;;  %v937_v14 = vmul.f32 2.0, %v921_v8  ;;  %v953_v16 = vmul.f32 %v921_v8, %v921_v8  ;;  %v1688_v17 = vpop.f32.mrb[12].mxu1 }
 0x2a9   : > { %1780 = vmatprep.subr.bf16.mxu1 %v2224_v18  ;;  %1041 = vst [vmem:[%s2705_s5 + $0x58] sm:$0xff] %v938_v11  ;;  %v924_v19 = vmul.f32 %v1939_v5, %v1688_v17  ;;  %v892_v20 = vpop.f32.mrb[13].mxu1 }
 0x2aa   : > { %v1787_v22 = vpack.c.bf16 %v954_v12, %v953_v16  ;;  %1040 = vst [vmem:[%s2705_s5 + $0x50] sm:$0xff] %v937_v14  ;;  %v1052_v23 = vpack.c.bf16 %v938_v11, %v937_v14  ;;  %v923_v24 = vmul.f32 %v1941_v9, %v892_v20 }
 0x2ab   : > { %v940_v27 = vmul.f32 2.0, %v924_v19  ;;  %v956_v28 = vmul.f32 %v924_v19, %v924_v19 }
 0x2ac   : > { %v939_v29 = vmul.f32 2.0, %v923_v24  ;;  %v955_v31 = vmul.f32 %v923_v24, %v923_v24  ;;  %v1691_v33 = vpop.f32.mrb[14].mxu1 }
 0x2ad   : > { %1043 = vst [vmem:[%s2705_s5 + $0x68] sm:$0xff] %v940_v27  ;;  %v926_v34 = vmul.f32 %v1943_v21, %v1691_v33  ;;  %v902_v35 = vpop.f32.mrb[15].mxu1 }
 0x2ae   : > { %v1790_v36 = vpack.c.bf16 %v956_v28, %v955_v31  ;;  %1042 = vst [vmem:[%s2705_s5 + $0x60] sm:$0xff] %v939_v29  ;;  %v1053_v37 = vpack.c.bf16 %v940_v27, %v939_v29  ;;  %v925_v38 = vmul.f32 %v1945_v25, %v902_v35 }
 0x2af   : > { %v942_v39 = vmul.f32 2.0, %v926_v34  ;;  %v958_v40 = vmul.f32 %v926_v34, %v926_v34 }
 0x2b0   : > { %1782 = vmatpush3.bf16.xpose.msra.mxu1 %v1781_v55  ;;  %v941_v42 = vmul.f32 2.0, %v925_v38  ;;  %v957_v44 = vmul.f32 %v925_v38, %v925_v38 }
 0x2b1   : > { %1783 = vmatprep.subr.bf16.mxu1 %v2224_v18  ;;  %1045 = vst [vmem:[%s2705_s5 + $0x78] sm:$0xff] %v942_v39 }
 0x2b2   : > { %v1793_v46 = vpack.c.bf16 %v958_v40, %v957_v44  ;;  %1044 = vst [vmem:[%s2705_s5 + $0x70] sm:$0xff] %v941_v42  ;;  %v1054_v49 = vpack.c.bf16 %v942_v39, %v941_v42 }
 0x2b8   : > { %1785 = vmatpush3.bf16.xpose.msra.mxu1 %v1784_v6 }
 0x2b9   : > { %1786 = vmatprep.subr.bf16.mxu1 %v2224_v18 }
 0x2c0   : > { %1788 = vmatpush3.bf16.xpose.msra.mxu1 %v1787_v22 }
 0x2c1   : > { %1789 = vmatprep.subr.bf16.mxu1 %v2224_v18 }
 0x2c8   : > { %1791 = vmatpush3.bf16.xpose.msra.mxu1 %v1790_v36 }
 0x2c9   : > { %1792 = vmatprep.subr.bf16.mxu1 %v2224_v18 }
 0x2d0   : > { %1794 = vmatpush3.bf16.xpose.msra.mxu1 %v1793_v46 }
 0x2d1   : > { %1747 = vmatprep.subr.bf16.mxu1 %v2222_v0 }
 0x2d7   : > { %1725 = vmatmul.mubr.f32.vlgmr.msra.gmra.mrb[16].mxu1 %v2225_v51 }
 0x2d8   : > { %1748 = vmatpush3.bf16.xpose.msra.mxu1 %v1047_v10  ;;  %1763 = vmatprep.mubr.msk.bf16.mxu1 %vm2223_vm0, %v2222_v0 }
 0x2d9   : > { %1749 = vmatprep.subr.bf16.mxu1 %v2222_v0 }
 0x2e0   : > { %1750 = vmatpush3.bf16.xpose.msra.mxu1 %v1048_v26 }
 0x2e1   : > { %1751 = vmatprep.subr.bf16.mxu1 %v2222_v0 }
 0x2e8   : > { %1752 = vmatpush3.bf16.xpose.msra.mxu1 %v1049_v41 }
 0x2e9   : > { %1753 = vmatprep.subr.bf16.mxu1 %v2222_v0 }
 0x2f0   : > { %1754 = vmatpush3.bf16.xpose.msra.mxu1 %v1050_v56 }
 0x2f1   : > { %1755 = vmatprep.subr.bf16.mxu1 %v2222_v0 }
 0x2f8   : > { %1756 = vmatpush3.bf16.xpose.msra.mxu1 %v1051_v7 }
 0x2f9   : > { %1757 = vmatprep.subr.bf16.mxu1 %v2222_v0 }
 0x300   : > { %1758 = vmatpush3.bf16.xpose.msra.mxu1 %v1052_v23 }
 0x301   : > { %1759 = vmatprep.subr.bf16.mxu1 %v2222_v0 }
 0x308   : > { %1760 = vmatpush3.bf16.xpose.msra.mxu1 %v1053_v37 }
 0x309   : > { %1761 = vmatprep.subr.bf16.mxu1 %v2222_v0 }
 0x310   : > { %1762 = vmatpush3.bf16.xpose.msra.mxu1 %v1054_v49 }
 0x317   : > { %1764 = vmatmul.mubr.bf16.vlgmr.msra.gmra.mrb[20].mxu1 %v1190_v50 }
 0x318   : > { %2077 = shalt.err (!%p2074_p11)
}
 0x319   : > { %s2078_s9 = scalar_lea.hbm %s2795_s26, 2048  ;;  %s2082_s13 = scalar_lea.hbm %s2926_s6, 6144 }
 0x31a   : > { %p2079_p0 = scmp.ne.s32.totalorder %s2795_s26, %s2078_s9  ;;  %p2083_p13 = scmp.lt.u32.totalorder %s2795_s26, %s2926_s6 }
 0x31b   : > { %p2084_p3 = scmp.lt.u32.totalorder %s2082_s13, %s2078_s9  ;;  %p2086_p4 = scmp.lt.u32.totalorder %s2078_s9, %s2795_s26 }
 0x31c   : > { %p2080_p2 = pnand %p2079_p0, %p2978_p9 }
 0x31d   : > { %p2085_p1 = por %p2084_p3, %p2083_p13 }
 0x31e   : > { %p2081_p8 = pneg %p2080_p2 }
 0x31f   : > { %p2087_p12 = por %p2086_p4, %p2085_p1 }
 0x321   : > { %p2088_p6 = pnand %p2087_p12, %p2081_p8 }
 0x323   : > { %2091 = shalt.err (!%p2088_p6)
}
 0x324   : > { %s2227_s8 = smov 128   ;;  %s2228_s19 = smov 8  }
 0x325   : > { %1806 = dma.vmem_to_hbm [thread:$0]  (%p2978_p9), %s2798_s20, 2048, %s2795_s26, %s2802_s1, %s2227_s8, %s2227_s8, %s2228_s19  }
 0x326   : > { %s417_s18 = scalar_lea.vmem [#allocation15], %s2508_s23  ;;  %s1575_s14 = sshll.u32 %s2206_s27, 4 }
 0x327   : > { %s1306_s29 = sshll.u32 %s417_s18, 4  ;;  %s2979_s22 = sld [smem:[#allocation30_spill]]  ;;  %s2836_s29 = int_to_ptr.vmem [resolvable:$true] %s1306_s29 }
 0x328   : > { %s2092_s12 = scalar_lea.vmem %s2836_s29, 16  ;;  %s2229_s26 = smov [#allocation15]  }
 0x329   : > { %p2093_p10 = scmp.ne.s32.totalorder %s2836_s29, %s2092_s12  ;;  %s2096_s20 = sshll.u32 %s2229_s26, 4  ;;  %s2097_s20 = int_to_ptr.vmem [resolvable:$false] %s2096_s20 }
 0x32a   : > { %s2098_s11 = scalar_lea.vmem %s2097_s20, 32  ;;  %p2099_p11 = scmp.lt.s32.totalorder %s2836_s29, %s2097_s20 }
 0x32b   : > { %p2094_p5 = pnand %p2093_p10, %p2978_p9  ;;  %p2100_p0 = scmp.lt.s32.totalorder %s2098_s11, %s2092_s12 }
 0x32d   : > { %s2834_s24 = scalar_lea.hbm %s2979_s22, %s1575_s14  ;;  %p2095_p7 = pneg %p2094_p5 }
 0x32e   : > { %p2101_p2 = por %p2100_p0, %p2099_p11 }
 0x330   : > { %p2102_p8 = pnand %p2101_p2, %p2095_p7 }
 0x3aa   : > { %v1025_v0 = vpop.f32.mrb[16].mxu1 }
 0x3ab   : > { %v1029_v18 = vsub.f32 0.0, %v1025_v0  ;;  %v1726_v43 = vpop.f32.mrb[17].mxu1 }
 0x3ad   : > { %1046 = vst [vmem:[%s417_s18] sm:$0x1] %v1029_v18  ;;  %1063 = vst [vmem:[#allocation3] sm:$0x1] %v1029_v18 }
 0x3ae   : > { %2105 = shalt.err (!%p2102_p8)
}
 0x3af   : > { %s2106_s30 = scalar_lea.hbm %s2834_s24, 16  ;;  %s2110_s17 = scalar_lea.hbm %s2979_s22, 48 }
 0x3b0   : > { %p2107_p13 = scmp.ne.s32.totalorder %s2834_s24, %s2106_s30  ;;  %p2111_p4 = scmp.lt.u32.totalorder %s2834_s24, %s2979_s22 }
 0x3b1   : > { %p2112_p12 = scmp.lt.u32.totalorder %s2110_s17, %s2106_s30  ;;  %p2114_p10 = scmp.lt.u32.totalorder %s2106_s30, %s2834_s24 }
 0x3b2   : > { %p2108_p3 = pnand %p2107_p13, %p2978_p9 }
 0x3b3   : > { %p2113_p6 = por %p2112_p12, %p2111_p4 }
 0x3b4   : > { %p2109_p1 = pneg %p2108_p3 }
 0x3b5   : > { %p2115_p5 = por %p2114_p10, %p2113_p6 }
 0x3b7   : > { %p2116_p7 = pnand %p2115_p5, %p2109_p1 }
 0x3b9   : > { %2119 = shalt.err (!%p2116_p7)
}
 0x3ba   : > { %1807 = dma.vmem_to_hbm [thread:$0]  (%p2978_p9), %s2836_s29, 16, %s2834_s24, %s2802_s1   ;;  %v1568_v47 = vld [vmem:[#allocation3] ss:$0 sm:$0xff] }
 0x3bb   : > { %s1513_s21 = sshll.u32 %s2508_s23, 4  ;;  %s1580_s14 = sshll.u32 %s2206_s27, 8 }
 0x3bc   : > { %s404_s16 = scalar_lea.vmem [#allocation12], %s1513_s21  ;;  %s2980_s5 = sld [smem:[#allocation29_spill]] }
 0x3bd   : > { %s1274_s18 = sshll.u32 %s404_s16, 4  ;;  %s1250_s24 = scalar_lea.sflag [#allocation6], %s2508_s23  ;;  %s2862_s18 = int_to_ptr.vmem [resolvable:$true] %s1274_s18 }
 0x3be   : > { %s2120_s12 = scalar_lea.vmem %s2862_s18, 256  ;;  %s2230_s27 = smov [#allocation12]  }
 0x3bf   : > { %p2121_p11 = scmp.ne.s32.totalorder %s2862_s18, %s2120_s12  ;;  %s2124_s26 = sshll.u32 %s2230_s27, 4  ;;  %s2125_s26 = int_to_ptr.vmem [resolvable:$false] %s2124_s26 }
 0x3c0   : > { %s2126_s20 = scalar_lea.vmem %s2125_s26, 512  ;;  %p2127_p8 = scmp.lt.s32.totalorder %s2862_s18, %s2125_s26 }
 0x3c1   : > { %p2122_p0 = pnand %p2121_p11, %p2978_p9  ;;  %p2128_p13 = scmp.lt.s32.totalorder %s2126_s20, %s2120_s12 }
 0x3c2   : > { %s2867_s7 = scalar_lea.hbm %s2980_s5, %s1580_s14 }
 0x3c3   : > { %p2123_p2 = pneg %p2122_p0  ;;  %p2129_p3 = por %p2128_p13, %p2127_p8 }
 0x3c5   : > { %p2130_p1 = pnand %p2129_p3, %p2123_p2 }
 0x3ea   : > { %v1240_v50 = vpop.f32.mrb[20].mxu1 }
 0x3eb   : > { %v1241_v60 = vadd.f32 %v1568_v47, %v1240_v50  ;;  %v1765_v62 = vpop.f32.mrb[21].mxu1 }
 0x3ec   : > { %v1243_v10 = vpop.f32.mrb[22].mxu1 }
 0x3ed   : > { %1247 = vst [vmem:[%s404_s16] sm:$0xff] %v1241_v60  ;;  %v1244_v13 = vadd.f32 %v1568_v47, %v1243_v10  ;;  %v1766_v15 = vpop.f32.mrb[23].mxu1 }
 0x3ef   : > { %1248 = vst [vmem:[%s404_s16 + $0x8] sm:$0xff] %v1244_v13 }
 0x3f0   : > { %2133 = shalt.err (!%p2130_p1)
}
 0x3f1   : > { %s2134_s11 = scalar_lea.hbm %s2867_s7, 256  ;;  %s2138_s9 = scalar_lea.hbm %s2980_s5, 768 }
 0x3f2   : > { %p2135_p4 = scmp.ne.s32.totalorder %s2867_s7, %s2134_s11  ;;  %p2139_p10 = scmp.lt.u32.totalorder %s2867_s7, %s2980_s5 }
 0x3f3   : > { %p2140_p5 = scmp.lt.u32.totalorder %s2138_s9, %s2134_s11  ;;  %p2142_p11 = scmp.lt.u32.totalorder %s2134_s11, %s2867_s7 }
 0x3f4   : > { %p2136_p12 = pnand %p2135_p4, %p2978_p9 }
 0x3f5   : > { %p2141_p7 = por %p2140_p5, %p2139_p10 }
 0x3f6   : > { %p2137_p6 = pneg %p2136_p12 }
 0x3f7   : > { %p2143_p0 = por %p2142_p11, %p2141_p7 }
 0x3f9   : > { %p2144_p2 = pnand %p2143_p0, %p2137_p6 }
 0x3fb   : > { %2147 = shalt.err (!%p2144_p2)
}
 0x3fc   : > { %1805 = dma.vmem_to_hbm [thread:$0]  (%p2978_p9), %s2862_s18, 256, %s2867_s7, %s1250_s24, %s2227_s8, %s2227_s8, %s2228_s19  }
 0x3fd PF: > { %s2981_s13 = sld [smem:[#allocation24_spill]]  ;;  %s2982_s21 = sld [smem:[#allocation21_spill]] }
 0x3fe   : > { %s2983_s16 = sld [smem:[#allocation27_spill]] }
 0x403   : > { %p1838_p8 = scmp.ge.s32.totalorder %s2981_s13, 2  ;;  %s1318_s14 = sand.u32 1, %s2982_s21  }
 0x404   : > { %p2984_p13 = scmp.ne.s32.totalorder %s2983_s16, 0  ;;  %s1319_s1 = scalar_lea.sflag [#allocation6], %s1318_s14 }
 0x406   : > { %p1826_p3 = pnand %p1838_p8, %p2984_p13 }
 0x408   : > { %2185 = dma.done.wait (!%p1826_p3), %s1319_s1, 256  }
 0x409   : > { %2187 = vsyncadd (!%p1826_p3), %s1319_s1, 4294967040  ;;  %s2985_s15 = sadd.s32 4294967294, %s2981_s13  }
 0x40a   : > { %s1327_s29 = sand.u32 1, %s2985_s15  }
 0x40b   : > { %s1328_s12 = scalar_lea.sflag [#allocation14], %s1327_s29 }
 0x40c   : > { %2189 = dma.done.wait (!%p1826_p3), %s1328_s12, 2064  }
 0x40d   : > { %2191 = vsyncadd (!%p1826_p3), %s1328_s12, 4294965232  ;;  %s31_s29 = sadd.s32 1, %s2981_s13   ;;  %s2986_s23 = sld [smem:[#allocation22_spill]] }
 0x40e   : > { %p28_p9 = scmp.ge.s32.totalorder %s31_s29, 5   ;;  %s2987_s26 = sld [smem:[#allocation26_spill]] }
 0x40f   : > { %s2988_s27 = sld [smem:[#allocation23_spill]]  ;;  %s2989_s28 = sld [smem:[#allocation25_spill]] }
 0x410   : > { %s2990_s24 = smov %s2198_s25  ;;  %30 = sbr.rel (!%p28_p9) target bundleno = 15 (0xf), region = 149 }
 0x413   : > { %s2991_s25 = smov %s2986_s23 }
 0x417   :  { %1341 = vsyncpa [#allocation5], 1 }
 0x418   :  { %1343 = vsyncpa [#allocation5 + $0x1], 1 }
 0x419   :  { %1344 = vsyncpa [#allocation8], 1 }
 0x41a   :  { %1346 = vsyncpa [#allocation8 + $0x1], 1 }
 0x41b   :  { %1347 = vsyncpa [#allocation11], 1 }
 0x41c   :  { %1348 = vsyncpa [#allocation6], 1 }
 0x41d   :  { %1350 = vsyncpa [#allocation6 + $0x1], 1 }
 0x41e   :  { %1351 = vsyncpa [#allocation14], 1 }
 0x41f   :  { %1353 = vsyncpa [#allocation14 + $0x1], 1 }

</bundles_post_ra>
